<compile_context>
chip_gen: v7x
topology: tpu7x:2x2x1
jax: 0.10.0
libtpu: 0.0.40
codegen_flags: <defaults>
</compile_context>

<pallas_src>
import functools

import jax
import jax.numpy as jnp
from jax.experimental import pallas as pl
from jax.experimental.pallas import tpu as pltpu

# ----- config (mirrors the fields Encoder.__init__ reads from `config`) -----
VOCAB_SIZE = 32
BLOCK_SIZE = 16          # max sequence length for pos_emb
N_EMBD = 32
PROJ_SIZE = 32
NUM_HEADS = 4
D_MODEL = 32             # MLP hidden = 4 * d_model = 128
N_LAYERS = 2
LN_EPS = 1e-5            # torch nn.LayerNorm default


def _layernorm(z, g, b):
    mu = jnp.mean(z, axis=-1, keepdims=True)
    var = jnp.mean((z - mu) * (z - mu), axis=-1, keepdims=True)
    return (z - mu) * jax.lax.rsqrt(var + LN_EPS) * g + b


def _gelu_tanh(h):
    # TODO(synk): torch nn.GELU() default is exact erf GELU; the tanh approximation is
    # used because erf has no guaranteed Mosaic lowering (numeric delta ~1e-3).
    return 0.5 * h * (1.0 + jnp.tanh(0.7978845608028654 * (h + 0.044715 * h * h * h)))


# ------------------------------ fused forward kernel ------------------------------
def _encoder_kernel(B, T, idx_ref, tok_ref, pos_ref,
                    wqkv_ref, bqkv_ref, wo_ref, bo_ref,
                    g1_ref, b1_ref, wfc1_ref, bfc1_ref,
                    wfc2_ref, bfc2_ref, g2_ref, b2_ref,
                    x_out_ref, *aw_refs):
    BT = B * T
    V = tok_ref.shape[0]
    H = NUM_HEADS
    P = PROJ_SIZE
    hd = P // H
    scale = 1.0 / (hd ** 0.5)
    n_layers = wqkv_ref.shape[0]

    # ---- token embedding: exact row gather as a one-hot matmul (V=32 fits VMEM) ----
    # TODO(synk): at a realistic vocab switch to a scalar-prefetch / per-row DMA gather
    # with tok_emb left in HBM (pl.ANY); the VMEM-resident table + O(T*V) one-hot MXU
    # pattern does not scale (v7x: 64 MiB VMEM per core).
    ids = idx_ref[...]                                              # (BT, 1) int32
    iota = jax.lax.broadcasted_iota(jnp.int32, (BT, V), 1)
    onehot = (iota == ids).astype(jnp.float32)                      # (BT, V)
    x = jnp.dot(onehot, tok_ref[...],
                preferred_element_type=jnp.float32) + pos_ref[...]  # (BT, C); embd drop=id

    # ----------------------------- encoder blocks ----------------------------------
    # Static unroll over layers (L=2 is best for LLO scheduling; switch to lax.fori_loop
    # with dynamic layer indexing only if N_LAYERS grows enough to create vreg pressure).
    for l in range(n_layers):
        # fused QKV projection over the whole folded batch: one (BT,C)x(C,3P) MXU matmul
        qkv = jnp.dot(x, wqkv_ref[l],
                      preferred_element_type=jnp.float32) + bqkv_ref[l]     # (BT, 3P)

        # head-major views over the folded batch: (H, BT, hd).  Built once per layer from
        # aligned lane slices + a leading-axis stack; all attention matmuls / softmax /
        # weight stores below are batched over the head axis.
        def heads(base, _qkv=qkv):
            return jnp.stack([_qkv[:, base + h * hd: base + (h + 1) * hd]
                              for h in range(H)], axis=0)
        q_all, k_all, v_all = heads(0), heads(P), heads(2 * P)

        # per-batch attention (batch handled as aligned sublane row blocks)
        # TODO(synk): padding_mask (masked_fill with -inf) not implemented; mask=None only.
        y_parts = []
        for b in range(B):
            rows = slice(b * T, (b + 1) * T)                         # static sublane slice
            qh, kh, vh = q_all[:, rows], k_all[:, rows], v_all[:, rows]   # (H, T, hd)
            att = jnp.einsum('hqd,hkd->hqk', qh, kh,
                             preferred_element_type=jnp.float32) * scale  # (H, T, T)
            att = att - jnp.max(att, axis=-1, keepdims=True)
            e = jnp.exp(att)
            w = e / jnp.sum(e, axis=-1, keepdims=True)               # exact divide (output)
            aw_refs[l][b] = w                                        # one (H,T,T) store
            y_parts.append(jnp.einsum('hqk,hkd->hqd', w, vh,
                                      preferred_element_type=jnp.float32))  # attn drop=id
        y_all = jnp.concatenate(y_parts, axis=1)                     # (H, BT, hd)
        y = jnp.concatenate([y_all[h] for h in range(H)], axis=1)    # (BT, P) merge heads

        attn_out = jnp.dot(y, wo_ref[l],
                           preferred_element_type=jnp.float32) + bo_ref[l]  # proj drop=id

        # x = ln1(x + attn_out)
        x = _layernorm(x + attn_out, g1_ref[l], b1_ref[l])

        # MLP: Linear -> GELU -> Linear   (mlp dropout = identity)
        h1 = _gelu_tanh(jnp.dot(x, wfc1_ref[l],
                                preferred_element_type=jnp.float32) + bfc1_ref[l])  # (BT,4D)
        mlp = jnp.dot(h1, wfc2_ref[l],
                      preferred_element_type=jnp.float32) + bfc2_ref[l]             # (BT, C)

        # x = x + ln2(x + mlp(x))   (matches the PyTorch EncoderBlock exactly)
        x = x + _layernorm(x + mlp, g2_ref[l], b2_ref[l])

    x_out_ref[...] = x                                               # single (BT, C) store


# ---------------------------------- wrapper -----------------------------------
_WEIGHT_NAMES = ["wqkv", "bqkv", "wo", "bo", "g1", "b1",
                 "wfc1", "bfc1", "wfc2", "bfc2", "g2", "b2"]


def encoder_forward(params, idx):
    B, T = idx.shape
    C = N_EMBD
    H = NUM_HEADS
    BT = B * T

    ids = idx.reshape(BT, 1).astype(jnp.int32)
    pos = jnp.tile(params["pos_emb"][0, :T, :], (B, 1))              # (BT, C)
    weights = [params[n] for n in _WEIGHT_NAMES]                     # each stacked (L, ...)

    vmem = pl.BlockSpec(memory_space=pltpu.MemorySpace.VMEM)         # whole-array VMEM block
    n_inputs = 3 + len(weights)

    out_shape = [jax.ShapeDtypeStruct((BT, C), jnp.float32)]
    for _ in range(N_LAYERS):
        out_shape.append(jax.ShapeDtypeStruct((B, H, T, T), jnp.float32))

    # Single invocation, no grid: every operand / result is one VMEM-resident block.
    outs = pl.pallas_call(
        functools.partial(_encoder_kernel, B, T),
        out_shape=tuple(out_shape),
        in_specs=[vmem] * n_inputs,
        out_specs=tuple([vmem] * len(out_shape)),
    )(ids, params["tok_emb"], pos, *weights)

    x = outs[0].reshape(B, T, C)
    attn_weights = {f"encoder_block_{i}": outs[1 + i] for i in range(N_LAYERS)}
    return x, attn_weights


# ----------------------------- pure-JAX reference ------------------------------
def _reference_forward(params, idx):
    B, T = idx.shape
    H, P = NUM_HEADS, PROJ_SIZE
    hd = P // H
    x = params["tok_emb"][idx] + params["pos_emb"][:, :T, :]         # (B, T, C)

    def ln(z, g, b):
        mu = z.mean(-1, keepdims=True)
        var = ((z - mu) ** 2).mean(-1, keepdims=True)
        return (z - mu) * jax.lax.rsqrt(var + LN_EPS) * g + b

    attn = {}
    for l in range(N_LAYERS):
        qkv = x @ params["wqkv"][l] + params["bqkv"][l]
        q, k, v = qkv[..., :P], qkv[..., P:2 * P], qkv[..., 2 * P:]

        def to_heads(m):
            return m.reshape(B, T, H, hd).transpose(0, 2, 1, 3)      # (B, H, T, hd)

        qh, kh, vh = to_heads(q), to_heads(k), to_heads(v)
        att = (qh @ kh.transpose(0, 1, 3, 2)) * (1.0 / hd ** 0.5)
        w = jax.nn.softmax(att, axis=-1)
        attn[f"encoder_block_{l}"] = w
        y = (w @ vh).transpose(0, 2, 1, 3).reshape(B, T, P)
        a = y @ params["wo"][l] + params["bo"][l]
        x = ln(x + a, params["g1"][l], params["b1"][l])
        h1 = _gelu_tanh(x @ params["wfc1"][l] + params["bfc1"][l])
        mlp = h1 @ params["wfc2"][l] + params["bfc2"][l]
        x = x + ln(x + mlp, params["g2"][l], params["b2"][l])
    return x, attn


# -------------------------- deterministic parameter init ----------------------
def init_params(key):
    keys = jax.random.split(key, 2 + N_LAYERS)
    tok_emb = jax.random.normal(keys[0], (VOCAB_SIZE, N_EMBD), jnp.float32) * 0.02
    pos_emb = jnp.zeros((1, BLOCK_SIZE, N_EMBD), jnp.float32)        # torch: Parameter(zeros)

    def dense(k, fi, fo):
        k1, k2 = jax.random.split(k)
        w = jax.random.normal(k1, (fi, fo), jnp.float32) / jnp.sqrt(fi)
        b = jax.random.normal(k2, (1, fo), jnp.float32) * 0.01
        return w, b

    per = {n: [] for n in _WEIGHT_NAMES}
    for i in range(N_LAYERS):
        lk = jax.random.split(keys[2 + i], 6)
        wq, bq = dense(lk[0], N_EMBD, PROJ_SIZE)
        wk, bk = dense(lk[1], N_EMBD, PROJ_SIZE)
        wv, bv = dense(lk[2], N_EMBD, PROJ_SIZE)
        wo, bo = dense(lk[3], PROJ_SIZE, N_EMBD)
        wfc1, bfc1 = dense(lk[4], N_EMBD, 4 * D_MODEL)
        wfc2, bfc2 = dense(lk[5], 4 * D_MODEL, N_EMBD)
        per["wqkv"].append(jnp.concatenate([wq, wk, wv], axis=1))    # (C, 3P) fused QKV
        per["bqkv"].append(jnp.concatenate([bq, bk, bv], axis=1))    # (1, 3P)
        per["wo"].append(wo)
        per["bo"].append(bo)
        per["g1"].append(jnp.ones((1, N_EMBD), jnp.float32))
        per["b1"].append(jnp.zeros((1, N_EMBD), jnp.float32))
        per["g2"].append(jnp.ones((1, N_EMBD), jnp.float32))
        per["b2"].append(jnp.zeros((1, N_EMBD), jnp.float32))
        per["wfc1"].append(wfc1)
        per["bfc1"].append(bfc1)
        per["wfc2"].append(wfc2)
        per["bfc2"].append(bfc2)

    params = {n: jnp.stack(v, axis=0) for n, v in per.items()}
    params["tok_emb"] = tok_emb
    params["pos_emb"] = pos_emb
    return params


if __name__ == "__main__":
    key = jax.random.PRNGKey(0)
    pkey, ikey = jax.random.split(key)
    params = init_params(pkey)

    B, T = 2, 8
    idx = jax.random.randint(ikey, (B, T), 0, VOCAB_SIZE, dtype=jnp.int32)

    fwd = jax.jit(encoder_forward)
    x, attn_w = fwd(params, idx)
    jax.block_until_ready((x, attn_w))

    # pure-JAX reference check (loose tolerance: MXU f32 pass decomposition differs
    # slightly from XLA's f32 matmul accumulation).
    with jax.default_matmul_precision("highest"):
        x_ref, attn_ref = _reference_forward(params, idx)

    assert x.shape == (B, T, N_EMBD) and x.dtype == jnp.float32
    assert bool(jnp.all(jnp.isfinite(x)))
    assert bool(jnp.allclose(x, x_ref, rtol=2e-2, atol=2e-2))
    for i in range(N_LAYERS):
        w = attn_w[f"encoder_block_{i}"]
        assert w.shape == (B, NUM_HEADS, T, T)
        assert bool(jnp.all(jnp.isfinite(w)))
        assert bool(jnp.allclose(w, attn_ref[f"encoder_block_{i}"], rtol=2e-2, atol=2e-2))
        assert bool(jnp.allclose(jnp.sum(w, axis=-1), 1.0, atol=1e-3))  # exact softmax rows
    print("KERNEL_OK")
</pallas_src>

<mosaic_0001>
module attributes {stable_mosaic.version = 11 : i64} {
  func.func @_encoder_kernel(%arg0: memref<16x1xi32, #tpu.memory_space<vmem>>, %arg1: memref<32x32xf32, #tpu.memory_space<vmem>>, %arg2: memref<16x32xf32, #tpu.memory_space<vmem>>, %arg3: memref<2x32x96xf32, #tpu.memory_space<vmem>>, %arg4: memref<2x1x96xf32, #tpu.memory_space<vmem>>, %arg5: memref<2x32x32xf32, #tpu.memory_space<vmem>>, %arg6: memref<2x1x32xf32, #tpu.memory_space<vmem>>, %arg7: memref<2x1x32xf32, #tpu.memory_space<vmem>>, %arg8: memref<2x1x32xf32, #tpu.memory_space<vmem>>, %arg9: memref<2x32x128xf32, #tpu.memory_space<vmem>>, %arg10: memref<2x1x128xf32, #tpu.memory_space<vmem>>, %arg11: memref<2x128x32xf32, #tpu.memory_space<vmem>>, %arg12: memref<2x1x32xf32, #tpu.memory_space<vmem>>, %arg13: memref<2x1x32xf32, #tpu.memory_space<vmem>>, %arg14: memref<2x1x32xf32, #tpu.memory_space<vmem>>, %arg15: memref<16x32xf32, #tpu.memory_space<vmem>>, %arg16: memref<2x4x8x8xf32, #tpu.memory_space<vmem>>, %arg17: memref<2x4x8x8xf32, #tpu.memory_space<vmem>>) attributes {dimension_semantics = [], scalar_prefetch = 0 : i64, scratch_operands = 0 : i64, tpu.core_type = #tpu.core_type<tc>} {
    %c0 = arith.constant 0 : index
    %c0_0 = arith.constant 0 : index
    %0 = vector.load %arg0[%c0, %c0_0] : memref<16x1xi32, #tpu.memory_space<vmem>>, vector<16x1xi32>
    %1 = tpu.iota {dimensions = array<i32: 1>} : vector<16x32xi32>
    %2 = vector.broadcast %0 : vector<16x1xi32> to vector<16x32xi32>
    %3 = arith.cmpi eq, %1, %2 : vector<16x32xi32>
    %4 = arith.extui %3 : vector<16x32xi1> to vector<16x32xi32>
    %5 = arith.sitofp %4 : vector<16x32xi32> to vector<16x32xf32>
    %c0_1 = arith.constant 0 : index
    %c0_2 = arith.constant 0 : index
    %6 = vector.load %arg1[%c0_1, %c0_2] : memref<32x32xf32, #tpu.memory_space<vmem>>, vector<32x32xf32>
    %cst = arith.constant dense<0.000000e+00> : vector<16x32xf32>
    %7 = tpu.matmul %5, %6, %cst {dimension_numbers = #tpu.dot_dimension_numbers<[1], [0], [0], [1], [0, 0, 1, 1], [], []>} : vector<16x32xf32>, vector<32x32xf32>, vector<16x32xf32> -> vector<16x32xf32>
    %c0_3 = arith.constant 0 : index
    %c0_4 = arith.constant 0 : index
    %8 = vector.load %arg2[%c0_3, %c0_4] : memref<16x32xf32, #tpu.memory_space<vmem>>, vector<16x32xf32>
    %9 = arith.addf %7, %8 : vector<16x32xf32>
    %c0_5 = arith.constant 0 : index
    %c0_6 = arith.constant 0 : index
    %c0_7 = arith.constant 0 : index
    %10 = vector.load %arg3[%c0_5, %c0_6, %c0_7] : memref<2x32x96xf32, #tpu.memory_space<vmem>>, vector<1x32x96xf32>
    %11 = vector.shape_cast %10 : vector<1x32x96xf32> to vector<32x96xf32>
    %cst_8 = arith.constant dense<0.000000e+00> : vector<16x96xf32>
    %12 = tpu.matmul %9, %11, %cst_8 {dimension_numbers = #tpu.dot_dimension_numbers<[1], [0], [0], [1], [0, 0, 1, 1], [], []>} : vector<16x32xf32>, vector<32x96xf32>, vector<16x96xf32> -> vector<16x96xf32>
    %c0_9 = arith.constant 0 : index
    %c0_10 = arith.constant 0 : index
    %c0_11 = arith.constant 0 : index
    %13 = vector.load %arg4[%c0_9, %c0_10, %c0_11] : memref<2x1x96xf32, #tpu.memory_space<vmem>>, vector<1x1x96xf32>
    %14 = vector.shape_cast %13 : vector<1x1x96xf32> to vector<1x96xf32>
    %15 = vector.broadcast %14 : vector<1x96xf32> to vector<16x96xf32>
    %16 = arith.addf %12, %15 : vector<16x96xf32>
    %17 = vector.extract_strided_slice %16 {offsets = [0, 0], sizes = [16, 8], strides = [1, 1]} : vector<16x96xf32> to vector<16x8xf32>
    %18 = vector.extract_strided_slice %16 {offsets = [0, 8], sizes = [16, 8], strides = [1, 1]} : vector<16x96xf32> to vector<16x8xf32>
    %19 = vector.extract_strided_slice %16 {offsets = [0, 16], sizes = [16, 8], strides = [1, 1]} : vector<16x96xf32> to vector<16x8xf32>
    %20 = vector.extract_strided_slice %16 {offsets = [0, 24], sizes = [16, 8], strides = [1, 1]} : vector<16x96xf32> to vector<16x8xf32>
    %21 = vector.shape_cast %17 : vector<16x8xf32> to vector<1x16x8xf32>
    %22 = vector.shape_cast %18 : vector<16x8xf32> to vector<1x16x8xf32>
    %23 = vector.shape_cast %19 : vector<16x8xf32> to vector<1x16x8xf32>
    %24 = vector.shape_cast %20 : vector<16x8xf32> to vector<1x16x8xf32>
    %25 = tpu.concatenate %21, %22, %23, %24 in 0 : vector<1x16x8xf32>, vector<1x16x8xf32>, vector<1x16x8xf32>, vector<1x16x8xf32> -> vector<4x16x8xf32>
    %26 = vector.extract_strided_slice %16 {offsets = [0, 32], sizes = [16, 8], strides = [1, 1]} : vector<16x96xf32> to vector<16x8xf32>
    %27 = vector.extract_strided_slice %16 {offsets = [0, 40], sizes = [16, 8], strides = [1, 1]} : vector<16x96xf32> to vector<16x8xf32>
    %28 = vector.extract_strided_slice %16 {offsets = [0, 48], sizes = [16, 8], strides = [1, 1]} : vector<16x96xf32> to vector<16x8xf32>
    %29 = vector.extract_strided_slice %16 {offsets = [0, 56], sizes = [16, 8], strides = [1, 1]} : vector<16x96xf32> to vector<16x8xf32>
    %30 = vector.shape_cast %26 : vector<16x8xf32> to vector<1x16x8xf32>
    %31 = vector.shape_cast %27 : vector<16x8xf32> to vector<1x16x8xf32>
    %32 = vector.shape_cast %28 : vector<16x8xf32> to vector<1x16x8xf32>
    %33 = vector.shape_cast %29 : vector<16x8xf32> to vector<1x16x8xf32>
    %34 = tpu.concatenate %30, %31, %32, %33 in 0 : vector<1x16x8xf32>, vector<1x16x8xf32>, vector<1x16x8xf32>, vector<1x16x8xf32> -> vector<4x16x8xf32>
    %35 = vector.extract_strided_slice %16 {offsets = [0, 64], sizes = [16, 8], strides = [1, 1]} : vector<16x96xf32> to vector<16x8xf32>
    %36 = vector.extract_strided_slice %16 {offsets = [0, 72], sizes = [16, 8], strides = [1, 1]} : vector<16x96xf32> to vector<16x8xf32>
    %37 = vector.extract_strided_slice %16 {offsets = [0, 80], sizes = [16, 8], strides = [1, 1]} : vector<16x96xf32> to vector<16x8xf32>
    %38 = vector.extract_strided_slice %16 {offsets = [0, 88], sizes = [16, 8], strides = [1, 1]} : vector<16x96xf32> to vector<16x8xf32>
    %39 = vector.shape_cast %35 : vector<16x8xf32> to vector<1x16x8xf32>
    %40 = vector.shape_cast %36 : vector<16x8xf32> to vector<1x16x8xf32>
    %41 = vector.shape_cast %37 : vector<16x8xf32> to vector<1x16x8xf32>
    %42 = vector.shape_cast %38 : vector<16x8xf32> to vector<1x16x8xf32>
    %43 = tpu.concatenate %39, %40, %41, %42 in 0 : vector<1x16x8xf32>, vector<1x16x8xf32>, vector<1x16x8xf32>, vector<1x16x8xf32> -> vector<4x16x8xf32>
    %44 = vector.extract_strided_slice %25 {offsets = [0, 0, 0], sizes = [4, 8, 8], strides = [1, 1, 1]} : vector<4x16x8xf32> to vector<4x8x8xf32>
    %45 = vector.extract_strided_slice %34 {offsets = [0, 0, 0], sizes = [4, 8, 8], strides = [1, 1, 1]} : vector<4x16x8xf32> to vector<4x8x8xf32>
    %46 = vector.extract_strided_slice %43 {offsets = [0, 0, 0], sizes = [4, 8, 8], strides = [1, 1, 1]} : vector<4x16x8xf32> to vector<4x8x8xf32>
    "tpu.trace_start"() <{level = 10 : i32, message = "hqd,hkd->hqk"}> : () -> ()
    %cst_12 = arith.constant dense<0.000000e+00> : vector<4x8x8xf32>
    %47 = tpu.matmul %44, %45, %cst_12 {dimension_numbers = #tpu.dot_dimension_numbers<[2], [2], [1], [1], [0, 0, 0, 1, 1, 1], [0], [0]>} : vector<4x8x8xf32>, vector<4x8x8xf32>, vector<4x8x8xf32> -> vector<4x8x8xf32>
    "tpu.trace_stop"() : () -> ()
    %cst_13 = arith.constant 0.353553385 : f32
    %48 = vector.broadcast %cst_13 : f32 to vector<4x8x8xf32>
    %49 = arith.mulf %47, %48 : vector<4x8x8xf32>
    %cst_14 = arith.constant dense<0xFF800000> : vector<4x8xf32>
    %50 = vector.multi_reduction <maximumf>, %49, %cst_14 [2] : vector<4x8x8xf32> to vector<4x8xf32>
    %51 = vector.shape_cast %50 : vector<4x8xf32> to vector<4x8x1xf32>
    %52 = vector.broadcast %51 : vector<4x8x1xf32> to vector<4x8x8xf32>
    %53 = arith.subf %49, %52 : vector<4x8x8xf32>
    %54 = math.exp %53 : vector<4x8x8xf32>
    %cst_15 = arith.constant dense<0.000000e+00> : vector<4x8xf32>
    %55 = vector.multi_reduction <add>, %54, %cst_15 [2] : vector<4x8x8xf32> to vector<4x8xf32>
    %56 = vector.shape_cast %55 : vector<4x8xf32> to vector<4x8x1xf32>
    %57 = vector.broadcast %56 : vector<4x8x1xf32> to vector<4x8x8xf32>
    %58 = arith.divf %54, %57 : vector<4x8x8xf32>
    %c0_16 = arith.constant 0 : index
    %c0_17 = arith.constant 0 : index
    %c0_18 = arith.constant 0 : index
    %c0_19 = arith.constant 0 : index
    %59 = vector.load %arg16[%c0_16, %c0_17, %c0_18, %c0_19] : memref<2x4x8x8xf32, #tpu.memory_space<vmem>>, vector<1x4x8x8xf32>
    %60 = vector.shape_cast %59 : vector<1x4x8x8xf32> to vector<4x8x8xf32>
    %61 = vector.shape_cast %58 : vector<4x8x8xf32> to vector<1x4x8x8xf32>
    tpu.vector_store %arg16[%c0_16, %c0_17, %c0_18, %c0_19], %61 {strides = array<i32>} : memref<2x4x8x8xf32, #tpu.memory_space<vmem>>, vector<1x4x8x8xf32>,
    "tpu.trace_start"() <{level = 10 : i32, message = "hqk,hkd->hqd"}> : () -> ()
    %cst_20 = arith.constant dense<0.000000e+00> : vector<4x8x8xf32>
    %62 = tpu.matmul %58, %46, %cst_20 {dimension_numbers = #tpu.dot_dimension_numbers<[2], [1], [1], [2], [0, 0, 0, 1, 1, 2], [0], [0]>} : vector<4x8x8xf32>, vector<4x8x8xf32>, vector<4x8x8xf32> -> vector<4x8x8xf32>
    "tpu.trace_stop"() : () -> ()
    %63 = vector.extract_strided_slice %25 {offsets = [0, 8, 0], sizes = [4, 8, 8], strides = [1, 1, 1]} : vector<4x16x8xf32> to vector<4x8x8xf32>
    %64 = vector.extract_strided_slice %34 {offsets = [0, 8, 0], sizes = [4, 8, 8], strides = [1, 1, 1]} : vector<4x16x8xf32> to vector<4x8x8xf32>
    %65 = vector.extract_strided_slice %43 {offsets = [0, 8, 0], sizes = [4, 8, 8], strides = [1, 1, 1]} : vector<4x16x8xf32> to vector<4x8x8xf32>
    "tpu.trace_start"() <{level = 10 : i32, message = "hqd,hkd->hqk"}> : () -> ()
    %cst_21 = arith.constant dense<0.000000e+00> : vector<4x8x8xf32>
    %66 = tpu.matmul %63, %64, %cst_21 {dimension_numbers = #tpu.dot_dimension_numbers<[2], [2], [1], [1], [0, 0, 0, 1, 1, 1], [0], [0]>} : vector<4x8x8xf32>, vector<4x8x8xf32>, vector<4x8x8xf32> -> vector<4x8x8xf32>
    "tpu.trace_stop"() : () -> ()
    %cst_22 = arith.constant 0.353553385 : f32
    %67 = vector.broadcast %cst_22 : f32 to vector<4x8x8xf32>
    %68 = arith.mulf %66, %67 : vector<4x8x8xf32>
    %cst_23 = arith.constant dense<0xFF800000> : vector<4x8xf32>
    %69 = vector.multi_reduction <maximumf>, %68, %cst_23 [2] : vector<4x8x8xf32> to vector<4x8xf32>
    %70 = vector.shape_cast %69 : vector<4x8xf32> to vector<4x8x1xf32>
    %71 = vector.broadcast %70 : vector<4x8x1xf32> to vector<4x8x8xf32>
    %72 = arith.subf %68, %71 : vector<4x8x8xf32>
    %73 = math.exp %72 : vector<4x8x8xf32>
    %cst_24 = arith.constant dense<0.000000e+00> : vector<4x8xf32>
    %74 = vector.multi_reduction <add>, %73, %cst_24 [2] : vector<4x8x8xf32> to vector<4x8xf32>
    %75 = vector.shape_cast %74 : vector<4x8xf32> to vector<4x8x1xf32>
    %76 = vector.broadcast %75 : vector<4x8x1xf32> to vector<4x8x8xf32>
    %77 = arith.divf %73, %76 : vector<4x8x8xf32>
    %c1 = arith.constant 1 : index
    %c0_25 = arith.constant 0 : index
    %c0_26 = arith.constant 0 : index
    %c0_27 = arith.constant 0 : index
    %78 = vector.load %arg16[%c1, %c0_25, %c0_26, %c0_27] : memref<2x4x8x8xf32, #tpu.memory_space<vmem>>, vector<1x4x8x8xf32>
    %79 = vector.shape_cast %78 : vector<1x4x8x8xf32> to vector<4x8x8xf32>
    %80 = vector.shape_cast %77 : vector<4x8x8xf32> to vector<1x4x8x8xf32>
    tpu.vector_store %arg16[%c1, %c0_25, %c0_26, %c0_27], %80 {strides = array<i32>} : memref<2x4x8x8xf32, #tpu.memory_space<vmem>>, vector<1x4x8x8xf32>,
    "tpu.trace_start"() <{level = 10 : i32, message = "hqk,hkd->hqd"}> : () -> ()
    %cst_28 = arith.constant dense<0.000000e+00> : vector<4x8x8xf32>
    %81 = tpu.matmul %77, %65, %cst_28 {dimension_numbers = #tpu.dot_dimension_numbers<[2], [1], [1], [2], [0, 0, 0, 1, 1, 2], [0], [0]>} : vector<4x8x8xf32>, vector<4x8x8xf32>, vector<4x8x8xf32> -> vector<4x8x8xf32>
    "tpu.trace_stop"() : () -> ()
    %82 = tpu.concatenate %62, %81 in 1 : vector<4x8x8xf32>, vector<4x8x8xf32> -> vector<4x16x8xf32>
    %83 = vector.extract_strided_slice %82 {offsets = [0, 0, 0], sizes = [1, 16, 8], strides = [1, 1, 1]} : vector<4x16x8xf32> to vector<1x16x8xf32>
    %84 = vector.shape_cast %83 : vector<1x16x8xf32> to vector<16x8xf32>
    %85 = vector.extract_strided_slice %82 {offsets = [1, 0, 0], sizes = [1, 16, 8], strides = [1, 1, 1]} : vector<4x16x8xf32> to vector<1x16x8xf32>
    %86 = vector.shape_cast %85 : vector<1x16x8xf32> to vector<16x8xf32>
    %87 = vector.extract_strided_slice %82 {offsets = [2, 0, 0], sizes = [1, 16, 8], strides = [1, 1, 1]} : vector<4x16x8xf32> to vector<1x16x8xf32>
    %88 = vector.shape_cast %87 : vector<1x16x8xf32> to vector<16x8xf32>
    %89 = vector.extract_strided_slice %82 {offsets = [3, 0, 0], sizes = [1, 16, 8], strides = [1, 1, 1]} : vector<4x16x8xf32> to vector<1x16x8xf32>
    %90 = vector.shape_cast %89 : vector<1x16x8xf32> to vector<16x8xf32>
    %91 = tpu.concatenate %84, %86, %88, %90 in 1 : vector<16x8xf32>, vector<16x8xf32>, vector<16x8xf32>, vector<16x8xf32> -> vector<16x32xf32>
    %c0_29 = arith.constant 0 : index
    %c0_30 = arith.constant 0 : index
    %c0_31 = arith.constant 0 : index
    %92 = vector.load %arg5[%c0_29, %c0_30, %c0_31] : memref<2x32x32xf32, #tpu.memory_space<vmem>>, vector<1x32x32xf32>
    %93 = vector.shape_cast %92 : vector<1x32x32xf32> to vector<32x32xf32>
    %cst_32 = arith.constant dense<0.000000e+00> : vector<16x32xf32>
    %94 = tpu.matmul %91, %93, %cst_32 {dimension_numbers = #tpu.dot_dimension_numbers<[1], [0], [0], [1], [0, 0, 1, 1], [], []>} : vector<16x32xf32>, vector<32x32xf32>, vector<16x32xf32> -> vector<16x32xf32>
    %c0_33 = arith.constant 0 : index
    %c0_34 = arith.constant 0 : index
    %c0_35 = arith.constant 0 : index
    %95 = vector.load %arg6[%c0_33, %c0_34, %c0_35] : memref<2x1x32xf32, #tpu.memory_space<vmem>>, vector<1x1x32xf32>
    %96 = vector.shape_cast %95 : vector<1x1x32xf32> to vector<1x32xf32>
    %97 = vector.broadcast %96 : vector<1x32xf32> to vector<16x32xf32>
    %98 = arith.addf %94, %97 : vector<16x32xf32>
    %99 = arith.addf %9, %98 : vector<16x32xf32>
    %c0_36 = arith.constant 0 : index
    %c0_37 = arith.constant 0 : index
    %c0_38 = arith.constant 0 : index
    %100 = vector.load %arg7[%c0_36, %c0_37, %c0_38] : memref<2x1x32xf32, #tpu.memory_space<vmem>>, vector<1x1x32xf32>
    %101 = vector.shape_cast %100 : vector<1x1x32xf32> to vector<1x32xf32>
    %c0_39 = arith.constant 0 : index
    %c0_40 = arith.constant 0 : index
    %c0_41 = arith.constant 0 : index
    %102 = vector.load %arg8[%c0_39, %c0_40, %c0_41] : memref<2x1x32xf32, #tpu.memory_space<vmem>>, vector<1x1x32xf32>
    %103 = vector.shape_cast %102 : vector<1x1x32xf32> to vector<1x32xf32>
    %cst_42 = arith.constant dense<0.000000e+00> : vector<16xf32>
    %104 = vector.multi_reduction <add>, %99, %cst_42 [1] : vector<16x32xf32> to vector<16xf32>
    %105 = vector.shape_cast %104 : vector<16xf32> to vector<16x1xf32>
    %cst_43 = arith.constant 3.200000e+01 : f32
    %106 = vector.broadcast %cst_43 : f32 to vector<16x1xf32>
    %107 = arith.divf %105, %106 : vector<16x1xf32>
    %108 = vector.broadcast %107 : vector<16x1xf32> to vector<16x32xf32>
    %109 = arith.subf %99, %108 : vector<16x32xf32>
    %110 = vector.broadcast %107 : vector<16x1xf32> to vector<16x32xf32>
    %111 = arith.subf %99, %110 : vector<16x32xf32>
    %112 = arith.mulf %109, %111 : vector<16x32xf32>
    %cst_44 = arith.constant dense<0.000000e+00> : vector<16xf32>
    %113 = vector.multi_reduction <add>, %112, %cst_44 [1] : vector<16x32xf32> to vector<16xf32>
    %114 = vector.shape_cast %113 : vector<16xf32> to vector<16x1xf32>
    %cst_45 = arith.constant 3.200000e+01 : f32
    %115 = vector.broadcast %cst_45 : f32 to vector<16x1xf32>
    %116 = arith.divf %114, %115 : vector<16x1xf32>
    %117 = vector.broadcast %107 : vector<16x1xf32> to vector<16x32xf32>
    %118 = arith.subf %99, %117 : vector<16x32xf32>
    %cst_46 = arith.constant 9.99999974E-6 : f32
    %119 = vector.broadcast %cst_46 : f32 to vector<16x1xf32>
    %120 = arith.addf %116, %119 : vector<16x1xf32>
    %121 = math.rsqrt %120 : vector<16x1xf32>
    %122 = vector.broadcast %121 : vector<16x1xf32> to vector<16x32xf32>
    %123 = arith.mulf %118, %122 : vector<16x32xf32>
    %124 = vector.broadcast %101 : vector<1x32xf32> to vector<16x32xf32>
    %125 = arith.mulf %123, %124 : vector<16x32xf32>
    %126 = vector.broadcast %103 : vector<1x32xf32> to vector<16x32xf32>
    %127 = arith.addf %125, %126 : vector<16x32xf32>
    %c0_47 = arith.constant 0 : index
    %c0_48 = arith.constant 0 : index
    %c0_49 = arith.constant 0 : index
    %128 = vector.load %arg9[%c0_47, %c0_48, %c0_49] : memref<2x32x128xf32, #tpu.memory_space<vmem>>, vector<1x32x128xf32>
    %129 = vector.shape_cast %128 : vector<1x32x128xf32> to vector<32x128xf32>
    %cst_50 = arith.constant dense<0.000000e+00> : vector<16x128xf32>
    %130 = tpu.matmul %127, %129, %cst_50 {dimension_numbers = #tpu.dot_dimension_numbers<[1], [0], [0], [1], [0, 0, 1, 1], [], []>} : vector<16x32xf32>, vector<32x128xf32>, vector<16x128xf32> -> vector<16x128xf32>
    %c0_51 = arith.constant 0 : index
    %c0_52 = arith.constant 0 : index
    %c0_53 = arith.constant 0 : index
    %131 = vector.load %arg10[%c0_51, %c0_52, %c0_53] : memref<2x1x128xf32, #tpu.memory_space<vmem>>, vector<1x1x128xf32>
    %132 = vector.shape_cast %131 : vector<1x1x128xf32> to vector<1x128xf32>
    %133 = vector.broadcast %132 : vector<1x128xf32> to vector<16x128xf32>
    %134 = arith.addf %130, %133 : vector<16x128xf32>
    %cst_54 = arith.constant 5.000000e-01 : f32
    %135 = vector.broadcast %cst_54 : f32 to vector<16x128xf32>
    %136 = arith.mulf %135, %134 : vector<16x128xf32>
    %cst_55 = arith.constant 4.471500e-02 : f32
    %137 = vector.broadcast %cst_55 : f32 to vector<16x128xf32>
    %138 = arith.mulf %137, %134 : vector<16x128xf32>
    %139 = arith.mulf %138, %134 : vector<16x128xf32>
    %140 = arith.mulf %139, %134 : vector<16x128xf32>
    %141 = arith.addf %134, %140 : vector<16x128xf32>
    %cst_56 = arith.constant 0.797884583 : f32
    %142 = vector.broadcast %cst_56 : f32 to vector<16x128xf32>
    %143 = arith.mulf %142, %141 : vector<16x128xf32>
    %144 = math.tanh %143 : vector<16x128xf32>
    %cst_57 = arith.constant 1.000000e+00 : f32
    %145 = vector.broadcast %cst_57 : f32 to vector<16x128xf32>
    %146 = arith.addf %145, %144 : vector<16x128xf32>
    %147 = arith.mulf %136, %146 : vector<16x128xf32>
    %c0_58 = arith.constant 0 : index
    %c0_59 = arith.constant 0 : index
    %c0_60 = arith.constant 0 : index
    %148 = vector.load %arg11[%c0_58, %c0_59, %c0_60] : memref<2x128x32xf32, #tpu.memory_space<vmem>>, vector<1x128x32xf32>
    %149 = vector.shape_cast %148 : vector<1x128x32xf32> to vector<128x32xf32>
    %cst_61 = arith.constant dense<0.000000e+00> : vector<16x32xf32>
    %150 = tpu.matmul %147, %149, %cst_61 {dimension_numbers = #tpu.dot_dimension_numbers<[1], [0], [0], [1], [0, 0, 1, 1], [], []>} : vector<16x128xf32>, vector<128x32xf32>, vector<16x32xf32> -> vector<16x32xf32>
    %c0_62 = arith.constant 0 : index
    %c0_63 = arith.constant 0 : index
    %c0_64 = arith.constant 0 : index
    %151 = vector.load %arg12[%c0_62, %c0_63, %c0_64] : memref<2x1x32xf32, #tpu.memory_space<vmem>>, vector<1x1x32xf32>
    %152 = vector.shape_cast %151 : vector<1x1x32xf32> to vector<1x32xf32>
    %153 = vector.broadcast %152 : vector<1x32xf32> to vector<16x32xf32>
    %154 = arith.addf %150, %153 : vector<16x32xf32>
    %155 = arith.addf %127, %154 : vector<16x32xf32>
    %c0_65 = arith.constant 0 : index
    %c0_66 = arith.constant 0 : index
    %c0_67 = arith.constant 0 : index
    %156 = vector.load %arg13[%c0_65, %c0_66, %c0_67] : memref<2x1x32xf32, #tpu.memory_space<vmem>>, vector<1x1x32xf32>
    %157 = vector.shape_cast %156 : vector<1x1x32xf32> to vector<1x32xf32>
    %c0_68 = arith.constant 0 : index
    %c0_69 = arith.constant 0 : index
    %c0_70 = arith.constant 0 : index
    %158 = vector.load %arg14[%c0_68, %c0_69, %c0_70] : memref<2x1x32xf32, #tpu.memory_space<vmem>>, vector<1x1x32xf32>
    %159 = vector.shape_cast %158 : vector<1x1x32xf32> to vector<1x32xf32>
    %cst_71 = arith.constant dense<0.000000e+00> : vector<16xf32>
    %160 = vector.multi_reduction <add>, %155, %cst_71 [1] : vector<16x32xf32> to vector<16xf32>
    %161 = vector.shape_cast %160 : vector<16xf32> to vector<16x1xf32>
    %cst_72 = arith.constant 3.200000e+01 : f32
    %162 = vector.broadcast %cst_72 : f32 to vector<16x1xf32>
    %163 = arith.divf %161, %162 : vector<16x1xf32>
    %164 = vector.broadcast %163 : vector<16x1xf32> to vector<16x32xf32>
    %165 = arith.subf %155, %164 : vector<16x32xf32>
    %166 = vector.broadcast %163 : vector<16x1xf32> to vector<16x32xf32>
    %167 = arith.subf %155, %166 : vector<16x32xf32>
    %168 = arith.mulf %165, %167 : vector<16x32xf32>
    %cst_73 = arith.constant dense<0.000000e+00> : vector<16xf32>
    %169 = vector.multi_reduction <add>, %168, %cst_73 [1] : vector<16x32xf32> to vector<16xf32>
    %170 = vector.shape_cast %169 : vector<16xf32> to vector<16x1xf32>
    %cst_74 = arith.constant 3.200000e+01 : f32
    %171 = vector.broadcast %cst_74 : f32 to vector<16x1xf32>
    %172 = arith.divf %170, %171 : vector<16x1xf32>
    %173 = vector.broadcast %163 : vector<16x1xf32> to vector<16x32xf32>
    %174 = arith.subf %155, %173 : vector<16x32xf32>
    %cst_75 = arith.constant 9.99999974E-6 : f32
    %175 = vector.broadcast %cst_75 : f32 to vector<16x1xf32>
    %176 = arith.addf %172, %175 : vector<16x1xf32>
    %177 = math.rsqrt %176 : vector<16x1xf32>
    %178 = vector.broadcast %177 : vector<16x1xf32> to vector<16x32xf32>
    %179 = arith.mulf %174, %178 : vector<16x32xf32>
    %180 = vector.broadcast %157 : vector<1x32xf32> to vector<16x32xf32>
    %181 = arith.mulf %179, %180 : vector<16x32xf32>
    %182 = vector.broadcast %159 : vector<1x32xf32> to vector<16x32xf32>
    %183 = arith.addf %181, %182 : vector<16x32xf32>
    %184 = arith.addf %127, %183 : vector<16x32xf32>
    %c1_76 = arith.constant 1 : index
    %c0_77 = arith.constant 0 : index
    %c0_78 = arith.constant 0 : index
    %185 = vector.load %arg3[%c1_76, %c0_77, %c0_78] : memref<2x32x96xf32, #tpu.memory_space<vmem>>, vector<1x32x96xf32>
    %186 = vector.shape_cast %185 : vector<1x32x96xf32> to vector<32x96xf32>
    %cst_79 = arith.constant dense<0.000000e+00> : vector<16x96xf32>
    %187 = tpu.matmul %184, %186, %cst_79 {dimension_numbers = #tpu.dot_dimension_numbers<[1], [0], [0], [1], [0, 0, 1, 1], [], []>} : vector<16x32xf32>, vector<32x96xf32>, vector<16x96xf32> -> vector<16x96xf32>
    %c1_80 = arith.constant 1 : index
    %c0_81 = arith.constant 0 : index
    %c0_82 = arith.constant 0 : index
    %188 = vector.load %arg4[%c1_80, %c0_81, %c0_82] : memref<2x1x96xf32, #tpu.memory_space<vmem>>, vector<1x1x96xf32>
    %189 = vector.shape_cast %188 : vector<1x1x96xf32> to vector<1x96xf32>
    %190 = vector.broadcast %189 : vector<1x96xf32> to vector<16x96xf32>
    %191 = arith.addf %187, %190 : vector<16x96xf32>
    %192 = vector.extract_strided_slice %191 {offsets = [0, 0], sizes = [16, 8], strides = [1, 1]} : vector<16x96xf32> to vector<16x8xf32>
    %193 = vector.extract_strided_slice %191 {offsets = [0, 8], sizes = [16, 8], strides = [1, 1]} : vector<16x96xf32> to vector<16x8xf32>
    %194 = vector.extract_strided_slice %191 {offsets = [0, 16], sizes = [16, 8], strides = [1, 1]} : vector<16x96xf32> to vector<16x8xf32>
    %195 = vector.extract_strided_slice %191 {offsets = [0, 24], sizes = [16, 8], strides = [1, 1]} : vector<16x96xf32> to vector<16x8xf32>
    %196 = vector.shape_cast %192 : vector<16x8xf32> to vector<1x16x8xf32>
    %197 = vector.shape_cast %193 : vector<16x8xf32> to vector<1x16x8xf32>
    %198 = vector.shape_cast %194 : vector<16x8xf32> to vector<1x16x8xf32>
    %199 = vector.shape_cast %195 : vector<16x8xf32> to vector<1x16x8xf32>
    %200 = tpu.concatenate %196, %197, %198, %199 in 0 : vector<1x16x8xf32>, vector<1x16x8xf32>, vector<1x16x8xf32>, vector<1x16x8xf32> -> vector<4x16x8xf32>
    %201 = vector.extract_strided_slice %191 {offsets = [0, 32], sizes = [16, 8], strides = [1, 1]} : vector<16x96xf32> to vector<16x8xf32>
    %202 = vector.extract_strided_slice %191 {offsets = [0, 40], sizes = [16, 8], strides = [1, 1]} : vector<16x96xf32> to vector<16x8xf32>
    %203 = vector.extract_strided_slice %191 {offsets = [0, 48], sizes = [16, 8], strides = [1, 1]} : vector<16x96xf32> to vector<16x8xf32>
    %204 = vector.extract_strided_slice %191 {offsets = [0, 56], sizes = [16, 8], strides = [1, 1]} : vector<16x96xf32> to vector<16x8xf32>
    %205 = vector.shape_cast %201 : vector<16x8xf32> to vector<1x16x8xf32>
    %206 = vector.shape_cast %202 : vector<16x8xf32> to vector<1x16x8xf32>
    %207 = vector.shape_cast %203 : vector<16x8xf32> to vector<1x16x8xf32>
    %208 = vector.shape_cast %204 : vector<16x8xf32> to vector<1x16x8xf32>
    %209 = tpu.concatenate %205, %206, %207, %208 in 0 : vector<1x16x8xf32>, vector<1x16x8xf32>, vector<1x16x8xf32>, vector<1x16x8xf32> -> vector<4x16x8xf32>
    %210 = vector.extract_strided_slice %191 {offsets = [0, 64], sizes = [16, 8], strides = [1, 1]} : vector<16x96xf32> to vector<16x8xf32>
    %211 = vector.extract_strided_slice %191 {offsets = [0, 72], sizes = [16, 8], strides = [1, 1]} : vector<16x96xf32> to vector<16x8xf32>
    %212 = vector.extract_strided_slice %191 {offsets = [0, 80], sizes = [16, 8], strides = [1, 1]} : vector<16x96xf32> to vector<16x8xf32>
    %213 = vector.extract_strided_slice %191 {offsets = [0, 88], sizes = [16, 8], strides = [1, 1]} : vector<16x96xf32> to vector<16x8xf32>
    %214 = vector.shape_cast %210 : vector<16x8xf32> to vector<1x16x8xf32>
    %215 = vector.shape_cast %211 : vector<16x8xf32> to vector<1x16x8xf32>
    %216 = vector.shape_cast %212 : vector<16x8xf32> to vector<1x16x8xf32>
    %217 = vector.shape_cast %213 : vector<16x8xf32> to vector<1x16x8xf32>
    %218 = tpu.concatenate %214, %215, %216, %217 in 0 : vector<1x16x8xf32>, vector<1x16x8xf32>, vector<1x16x8xf32>, vector<1x16x8xf32> -> vector<4x16x8xf32>
    %219 = vector.extract_strided_slice %200 {offsets = [0, 0, 0], sizes = [4, 8, 8], strides = [1, 1, 1]} : vector<4x16x8xf32> to vector<4x8x8xf32>
    %220 = vector.extract_strided_slice %209 {offsets = [0, 0, 0], sizes = [4, 8, 8], strides = [1, 1, 1]} : vector<4x16x8xf32> to vector<4x8x8xf32>
    %221 = vector.extract_strided_slice %218 {offsets = [0, 0, 0], sizes = [4, 8, 8], strides = [1, 1, 1]} : vector<4x16x8xf32> to vector<4x8x8xf32>
    "tpu.trace_start"() <{level = 10 : i32, message = "hqd,hkd->hqk"}> : () -> ()
    %cst_83 = arith.constant dense<0.000000e+00> : vector<4x8x8xf32>
    %222 = tpu.matmul %219, %220, %cst_83 {dimension_numbers = #tpu.dot_dimension_numbers<[2], [2], [1], [1], [0, 0, 0, 1, 1, 1], [0], [0]>} : vector<4x8x8xf32>, vector<4x8x8xf32>, vector<4x8x8xf32> -> vector<4x8x8xf32>
    "tpu.trace_stop"() : () -> ()
    %cst_84 = arith.constant 0.353553385 : f32
    %223 = vector.broadcast %cst_84 : f32 to vector<4x8x8xf32>
    %224 = arith.mulf %222, %223 : vector<4x8x8xf32>
    %cst_85 = arith.constant dense<0xFF800000> : vector<4x8xf32>
    %225 = vector.multi_reduction <maximumf>, %224, %cst_85 [2] : vector<4x8x8xf32> to vector<4x8xf32>
    %226 = vector.shape_cast %225 : vector<4x8xf32> to vector<4x8x1xf32>
    %227 = vector.broadcast %226 : vector<4x8x1xf32> to vector<4x8x8xf32>
    %228 = arith.subf %224, %227 : vector<4x8x8xf32>
    %229 = math.exp %228 : vector<4x8x8xf32>
    %cst_86 = arith.constant dense<0.000000e+00> : vector<4x8xf32>
    %230 = vector.multi_reduction <add>, %229, %cst_86 [2] : vector<4x8x8xf32> to vector<4x8xf32>
    %231 = vector.shape_cast %230 : vector<4x8xf32> to vector<4x8x1xf32>
    %232 = vector.broadcast %231 : vector<4x8x1xf32> to vector<4x8x8xf32>
    %233 = arith.divf %229, %232 : vector<4x8x8xf32>
    %c0_87 = arith.constant 0 : index
    %c0_88 = arith.constant 0 : index
    %c0_89 = arith.constant 0 : index
    %c0_90 = arith.constant 0 : index
    %234 = vector.load %arg17[%c0_87, %c0_88, %c0_89, %c0_90] : memref<2x4x8x8xf32, #tpu.memory_space<vmem>>, vector<1x4x8x8xf32>
    %235 = vector.shape_cast %234 : vector<1x4x8x8xf32> to vector<4x8x8xf32>
    %236 = vector.shape_cast %233 : vector<4x8x8xf32> to vector<1x4x8x8xf32>
    tpu.vector_store %arg17[%c0_87, %c0_88, %c0_89, %c0_90], %236 {strides = array<i32>} : memref<2x4x8x8xf32, #tpu.memory_space<vmem>>, vector<1x4x8x8xf32>,
    "tpu.trace_start"() <{level = 10 : i32, message = "hqk,hkd->hqd"}> : () -> ()
    %cst_91 = arith.constant dense<0.000000e+00> : vector<4x8x8xf32>
    %237 = tpu.matmul %233, %221, %cst_91 {dimension_numbers = #tpu.dot_dimension_numbers<[2], [1], [1], [2], [0, 0, 0, 1, 1, 2], [0], [0]>} : vector<4x8x8xf32>, vector<4x8x8xf32>, vector<4x8x8xf32> -> vector<4x8x8xf32>
    "tpu.trace_stop"() : () -> ()
    %238 = vector.extract_strided_slice %200 {offsets = [0, 8, 0], sizes = [4, 8, 8], strides = [1, 1, 1]} : vector<4x16x8xf32> to vector<4x8x8xf32>
    %239 = vector.extract_strided_slice %209 {offsets = [0, 8, 0], sizes = [4, 8, 8], strides = [1, 1, 1]} : vector<4x16x8xf32> to vector<4x8x8xf32>
    %240 = vector.extract_strided_slice %218 {offsets = [0, 8, 0], sizes = [4, 8, 8], strides = [1, 1, 1]} : vector<4x16x8xf32> to vector<4x8x8xf32>
    "tpu.trace_start"() <{level = 10 : i32, message = "hqd,hkd->hqk"}> : () -> ()
    %cst_92 = arith.constant dense<0.000000e+00> : vector<4x8x8xf32>
    %241 = tpu.matmul %238, %239, %cst_92 {dimension_numbers = #tpu.dot_dimension_numbers<[2], [2], [1], [1], [0, 0, 0, 1, 1, 1], [0], [0]>} : vector<4x8x8xf32>, vector<4x8x8xf32>, vector<4x8x8xf32> -> vector<4x8x8xf32>
    "tpu.trace_stop"() : () -> ()
    %cst_93 = arith.constant 0.353553385 : f32
    %242 = vector.broadcast %cst_93 : f32 to vector<4x8x8xf32>
    %243 = arith.mulf %241, %242 : vector<4x8x8xf32>
    %cst_94 = arith.constant dense<0xFF800000> : vector<4x8xf32>
    %244 = vector.multi_reduction <maximumf>, %243, %cst_94 [2] : vector<4x8x8xf32> to vector<4x8xf32>
    %245 = vector.shape_cast %244 : vector<4x8xf32> to vector<4x8x1xf32>
    %246 = vector.broadcast %245 : vector<4x8x1xf32> to vector<4x8x8xf32>
    %247 = arith.subf %243, %246 : vector<4x8x8xf32>
    %248 = math.exp %247 : vector<4x8x8xf32>
    %cst_95 = arith.constant dense<0.000000e+00> : vector<4x8xf32>
    %249 = vector.multi_reduction <add>, %248, %cst_95 [2] : vector<4x8x8xf32> to vector<4x8xf32>
    %250 = vector.shape_cast %249 : vector<4x8xf32> to vector<4x8x1xf32>
    %251 = vector.broadcast %250 : vector<4x8x1xf32> to vector<4x8x8xf32>
    %252 = arith.divf %248, %251 : vector<4x8x8xf32>
    %c1_96 = arith.constant 1 : index
    %c0_97 = arith.constant 0 : index
    %c0_98 = arith.constant 0 : index
    %c0_99 = arith.constant 0 : index
    %253 = vector.load %arg17[%c1_96, %c0_97, %c0_98, %c0_99] : memref<2x4x8x8xf32, #tpu.memory_space<vmem>>, vector<1x4x8x8xf32>
    %254 = vector.shape_cast %253 : vector<1x4x8x8xf32> to vector<4x8x8xf32>
    %255 = vector.shape_cast %252 : vector<4x8x8xf32> to vector<1x4x8x8xf32>
    tpu.vector_store %arg17[%c1_96, %c0_97, %c0_98, %c0_99], %255 {strides = array<i32>} : memref<2x4x8x8xf32, #tpu.memory_space<vmem>>, vector<1x4x8x8xf32>,
    "tpu.trace_start"() <{level = 10 : i32, message = "hqk,hkd->hqd"}> : () -> ()
    %cst_100 = arith.constant dense<0.000000e+00> : vector<4x8x8xf32>
    %256 = tpu.matmul %252, %240, %cst_100 {dimension_numbers = #tpu.dot_dimension_numbers<[2], [1], [1], [2], [0, 0, 0, 1, 1, 2], [0], [0]>} : vector<4x8x8xf32>, vector<4x8x8xf32>, vector<4x8x8xf32> -> vector<4x8x8xf32>
    "tpu.trace_stop"() : () -> ()
    %257 = tpu.concatenate %237, %256 in 1 : vector<4x8x8xf32>, vector<4x8x8xf32> -> vector<4x16x8xf32>
    %258 = vector.extract_strided_slice %257 {offsets = [0, 0, 0], sizes = [1, 16, 8], strides = [1, 1, 1]} : vector<4x16x8xf32> to vector<1x16x8xf32>
    %259 = vector.shape_cast %258 : vector<1x16x8xf32> to vector<16x8xf32>
    %260 = vector.extract_strided_slice %257 {offsets = [1, 0, 0], sizes = [1, 16, 8], strides = [1, 1, 1]} : vector<4x16x8xf32> to vector<1x16x8xf32>
    %261 = vector.shape_cast %260 : vector<1x16x8xf32> to vector<16x8xf32>
    %262 = vector.extract_strided_slice %257 {offsets = [2, 0, 0], sizes = [1, 16, 8], strides = [1, 1, 1]} : vector<4x16x8xf32> to vector<1x16x8xf32>
    %263 = vector.shape_cast %262 : vector<1x16x8xf32> to vector<16x8xf32>
    %264 = vector.extract_strided_slice %257 {offsets = [3, 0, 0], sizes = [1, 16, 8], strides = [1, 1, 1]} : vector<4x16x8xf32> to vector<1x16x8xf32>
    %265 = vector.shape_cast %264 : vector<1x16x8xf32> to vector<16x8xf32>
    %266 = tpu.concatenate %259, %261, %263, %265 in 1 : vector<16x8xf32>, vector<16x8xf32>, vector<16x8xf32>, vector<16x8xf32> -> vector<16x32xf32>
    %c1_101 = arith.constant 1 : index
    %c0_102 = arith.constant 0 : index
    %c0_103 = arith.constant 0 : index
    %267 = vector.load %arg5[%c1_101, %c0_102, %c0_103] : memref<2x32x32xf32, #tpu.memory_space<vmem>>, vector<1x32x32xf32>
    %268 = vector.shape_cast %267 : vector<1x32x32xf32> to vector<32x32xf32>
    %cst_104 = arith.constant dense<0.000000e+00> : vector<16x32xf32>
    %269 = tpu.matmul %266, %268, %cst_104 {dimension_numbers = #tpu.dot_dimension_numbers<[1], [0], [0], [1], [0, 0, 1, 1], [], []>} : vector<16x32xf32>, vector<32x32xf32>, vector<16x32xf32> -> vector<16x32xf32>
    %c1_105 = arith.constant 1 : index
    %c0_106 = arith.constant 0 : index
    %c0_107 = arith.constant 0 : index
    %270 = vector.load %arg6[%c1_105, %c0_106, %c0_107] : memref<2x1x32xf32, #tpu.memory_space<vmem>>, vector<1x1x32xf32>
    %271 = vector.shape_cast %270 : vector<1x1x32xf32> to vector<1x32xf32>
    %272 = vector.broadcast %271 : vector<1x32xf32> to vector<16x32xf32>
    %273 = arith.addf %269, %272 : vector<16x32xf32>
    %274 = arith.addf %184, %273 : vector<16x32xf32>
    %c1_108 = arith.constant 1 : index
    %c0_109 = arith.constant 0 : index
    %c0_110 = arith.constant 0 : index
    %275 = vector.load %arg7[%c1_108, %c0_109, %c0_110] : memref<2x1x32xf32, #tpu.memory_space<vmem>>, vector<1x1x32xf32>
    %276 = vector.shape_cast %275 : vector<1x1x32xf32> to vector<1x32xf32>
    %c1_111 = arith.constant 1 : index
    %c0_112 = arith.constant 0 : index
    %c0_113 = arith.constant 0 : index
    %277 = vector.load %arg8[%c1_111, %c0_112, %c0_113] : memref<2x1x32xf32, #tpu.memory_space<vmem>>, vector<1x1x32xf32>
    %278 = vector.shape_cast %277 : vector<1x1x32xf32> to vector<1x32xf32>
    %cst_114 = arith.constant dense<0.000000e+00> : vector<16xf32>
    %279 = vector.multi_reduction <add>, %274, %cst_114 [1] : vector<16x32xf32> to vector<16xf32>
    %280 = vector.shape_cast %279 : vector<16xf32> to vector<16x1xf32>
    %cst_115 = arith.constant 3.200000e+01 : f32
    %281 = vector.broadcast %cst_115 : f32 to vector<16x1xf32>
    %282 = arith.divf %280, %281 : vector<16x1xf32>
    %283 = vector.broadcast %282 : vector<16x1xf32> to vector<16x32xf32>
    %284 = arith.subf %274, %283 : vector<16x32xf32>
    %285 = vector.broadcast %282 : vector<16x1xf32> to vector<16x32xf32>
    %286 = arith.subf %274, %285 : vector<16x32xf32>
    %287 = arith.mulf %284, %286 : vector<16x32xf32>
    %cst_116 = arith.constant dense<0.000000e+00> : vector<16xf32>
    %288 = vector.multi_reduction <add>, %287, %cst_116 [1] : vector<16x32xf32> to vector<16xf32>
    %289 = vector.shape_cast %288 : vector<16xf32> to vector<16x1xf32>
    %cst_117 = arith.constant 3.200000e+01 : f32
    %290 = vector.broadcast %cst_117 : f32 to vector<16x1xf32>
    %291 = arith.divf %289, %290 : vector<16x1xf32>
    %292 = vector.broadcast %282 : vector<16x1xf32> to vector<16x32xf32>
    %293 = arith.subf %274, %292 : vector<16x32xf32>
    %cst_118 = arith.constant 9.99999974E-6 : f32
    %294 = vector.broadcast %cst_118 : f32 to vector<16x1xf32>
    %295 = arith.addf %291, %294 : vector<16x1xf32>
    %296 = math.rsqrt %295 : vector<16x1xf32>
    %297 = vector.broadcast %296 : vector<16x1xf32> to vector<16x32xf32>
    %298 = arith.mulf %293, %297 : vector<16x32xf32>
    %299 = vector.broadcast %276 : vector<1x32xf32> to vector<16x32xf32>
    %300 = arith.mulf %298, %299 : vector<16x32xf32>
    %301 = vector.broadcast %278 : vector<1x32xf32> to vector<16x32xf32>
    %302 = arith.addf %300, %301 : vector<16x32xf32>
    %c1_119 = arith.constant 1 : index
    %c0_120 = arith.constant 0 : index
    %c0_121 = arith.constant 0 : index
    %303 = vector.load %arg9[%c1_119, %c0_120, %c0_121] : memref<2x32x128xf32, #tpu.memory_space<vmem>>, vector<1x32x128xf32>
    %304 = vector.shape_cast %303 : vector<1x32x128xf32> to vector<32x128xf32>
    %cst_122 = arith.constant dense<0.000000e+00> : vector<16x128xf32>
    %305 = tpu.matmul %302, %304, %cst_122 {dimension_numbers = #tpu.dot_dimension_numbers<[1], [0], [0], [1], [0, 0, 1, 1], [], []>} : vector<16x32xf32>, vector<32x128xf32>, vector<16x128xf32> -> vector<16x128xf32>
    %c1_123 = arith.constant 1 : index
    %c0_124 = arith.constant 0 : index
    %c0_125 = arith.constant 0 : index
    %306 = vector.load %arg10[%c1_123, %c0_124, %c0_125] : memref<2x1x128xf32, #tpu.memory_space<vmem>>, vector<1x1x128xf32>
    %307 = vector.shape_cast %306 : vector<1x1x128xf32> to vector<1x128xf32>
    %308 = vector.broadcast %307 : vector<1x128xf32> to vector<16x128xf32>
    %309 = arith.addf %305, %308 : vector<16x128xf32>
    %cst_126 = arith.constant 5.000000e-01 : f32
    %310 = vector.broadcast %cst_126 : f32 to vector<16x128xf32>
    %311 = arith.mulf %310, %309 : vector<16x128xf32>
    %cst_127 = arith.constant 4.471500e-02 : f32
    %312 = vector.broadcast %cst_127 : f32 to vector<16x128xf32>
    %313 = arith.mulf %312, %309 : vector<16x128xf32>
    %314 = arith.mulf %313, %309 : vector<16x128xf32>
    %315 = arith.mulf %314, %309 : vector<16x128xf32>
    %316 = arith.addf %309, %315 : vector<16x128xf32>
    %cst_128 = arith.constant 0.797884583 : f32
    %317 = vector.broadcast %cst_128 : f32 to vector<16x128xf32>
    %318 = arith.mulf %317, %316 : vector<16x128xf32>
    %319 = math.tanh %318 : vector<16x128xf32>
    %cst_129 = arith.constant 1.000000e+00 : f32
    %320 = vector.broadcast %cst_129 : f32 to vector<16x128xf32>
    %321 = arith.addf %320, %319 : vector<16x128xf32>
    %322 = arith.mulf %311, %321 : vector<16x128xf32>
    %c1_130 = arith.constant 1 : index
    %c0_131 = arith.constant 0 : index
    %c0_132 = arith.constant 0 : index
    %323 = vector.load %arg11[%c1_130, %c0_131, %c0_132] : memref<2x128x32xf32, #tpu.memory_space<vmem>>, vector<1x128x32xf32>
    %324 = vector.shape_cast %323 : vector<1x128x32xf32> to vector<128x32xf32>
    %cst_133 = arith.constant dense<0.000000e+00> : vector<16x32xf32>
    %325 = tpu.matmul %322, %324, %cst_133 {dimension_numbers = #tpu.dot_dimension_numbers<[1], [0], [0], [1], [0, 0, 1, 1], [], []>} : vector<16x128xf32>, vector<128x32xf32>, vector<16x32xf32> -> vector<16x32xf32>
    %c1_134 = arith.constant 1 : index
    %c0_135 = arith.constant 0 : index
    %c0_136 = arith.constant 0 : index
    %326 = vector.load %arg12[%c1_134, %c0_135, %c0_136] : memref<2x1x32xf32, #tpu.memory_space<vmem>>, vector<1x1x32xf32>
    %327 = vector.shape_cast %326 : vector<1x1x32xf32> to vector<1x32xf32>
    %328 = vector.broadcast %327 : vector<1x32xf32> to vector<16x32xf32>
    %329 = arith.addf %325, %328 : vector<16x32xf32>
    %330 = arith.addf %302, %329 : vector<16x32xf32>
    %c1_137 = arith.constant 1 : index
    %c0_138 = arith.constant 0 : index
    %c0_139 = arith.constant 0 : index
    %331 = vector.load %arg13[%c1_137, %c0_138, %c0_139] : memref<2x1x32xf32, #tpu.memory_space<vmem>>, vector<1x1x32xf32>
    %332 = vector.shape_cast %331 : vector<1x1x32xf32> to vector<1x32xf32>
    %c1_140 = arith.constant 1 : index
    %c0_141 = arith.constant 0 : index
    %c0_142 = arith.constant 0 : index
    %333 = vector.load %arg14[%c1_140, %c0_141, %c0_142] : memref<2x1x32xf32, #tpu.memory_space<vmem>>, vector<1x1x32xf32>
    %334 = vector.shape_cast %333 : vector<1x1x32xf32> to vector<1x32xf32>
    %cst_143 = arith.constant dense<0.000000e+00> : vector<16xf32>
    %335 = vector.multi_reduction <add>, %330, %cst_143 [1] : vector<16x32xf32> to vector<16xf32>
    %336 = vector.shape_cast %335 : vector<16xf32> to vector<16x1xf32>
    %cst_144 = arith.constant 3.200000e+01 : f32
    %337 = vector.broadcast %cst_144 : f32 to vector<16x1xf32>
    %338 = arith.divf %336, %337 : vector<16x1xf32>
    %339 = vector.broadcast %338 : vector<16x1xf32> to vector<16x32xf32>
    %340 = arith.subf %330, %339 : vector<16x32xf32>
    %341 = vector.broadcast %338 : vector<16x1xf32> to vector<16x32xf32>
    %342 = arith.subf %330, %341 : vector<16x32xf32>
    %343 = arith.mulf %340, %342 : vector<16x32xf32>
    %cst_145 = arith.constant dense<0.000000e+00> : vector<16xf32>
    %344 = vector.multi_reduction <add>, %343, %cst_145 [1] : vector<16x32xf32> to vector<16xf32>
    %345 = vector.shape_cast %344 : vector<16xf32> to vector<16x1xf32>
    %cst_146 = arith.constant 3.200000e+01 : f32
    %346 = vector.broadcast %cst_146 : f32 to vector<16x1xf32>
    %347 = arith.divf %345, %346 : vector<16x1xf32>
    %348 = vector.broadcast %338 : vector<16x1xf32> to vector<16x32xf32>
    %349 = arith.subf %330, %348 : vector<16x32xf32>
    %cst_147 = arith.constant 9.99999974E-6 : f32
    %350 = vector.broadcast %cst_147 : f32 to vector<16x1xf32>
    %351 = arith.addf %347, %350 : vector<16x1xf32>
    %352 = math.rsqrt %351 : vector<16x1xf32>
    %353 = vector.broadcast %352 : vector<16x1xf32> to vector<16x32xf32>
    %354 = arith.mulf %349, %353 : vector<16x32xf32>
    %355 = vector.broadcast %332 : vector<1x32xf32> to vector<16x32xf32>
    %356 = arith.mulf %354, %355 : vector<16x32xf32>
    %357 = vector.broadcast %334 : vector<1x32xf32> to vector<16x32xf32>
    %358 = arith.addf %356, %357 : vector<16x32xf32>
    %359 = arith.addf %302, %358 : vector<16x32xf32>
    %c0_148 = arith.constant 0 : index
    %c0_149 = arith.constant 0 : index
    %360 = vector.load %arg15[%c0_148, %c0_149] : memref<16x32xf32, #tpu.memory_space<vmem>>, vector<16x32xf32>
    tpu.vector_store %arg15[%c0_148, %c0_149], %359 {strides = array<i32>} : memref<16x32xf32, #tpu.memory_space<vmem>>, vector<16x32xf32>,
    return
  }
}

</mosaic_0001>

<bundles_post_ra>
// kernel: encoder_forward.1
= control target key start
LH: loop header
LB: loop body
LE: loop exit
PB: predicated region body
PF: predicated region fallthrough
CT: control target
= control target key end

     0   :  { %s5557_s0 = inlined_call_operand.vmem [shape: s32[16,1], index: 0, kind: input, shape index: {}]   ;;  %s5558_s1 = inlined_call_operand.vmem [shape: f32[32,32], index: 1, kind: input, shape index: {}]   ;;  %s5559_s2 = inlined_call_operand.vmem [shape: f32[16,32], index: 2, kind: input, shape index: {}]   ;;  %s5560_s3 = inlined_call_operand.vmem [shape: f32[2,32,96], index: 3, kind: input, shape index: {}]   ;;  %s5561_s4 = inlined_call_operand.vmem [shape: f32[2,1,96], index: 4, kind: input, shape index: {}]   ;;  %s5562_s5 = inlined_call_operand.vmem [shape: f32[2,32,32], index: 5, kind: input, shape index: {}]   ;;  %s5563_s6 = inlined_call_operand.vmem [shape: f32[2,1,32], index: 6, kind: input, shape index: {}]   ;;  %s5564_s7 = inlined_call_operand.vmem [shape: f32[2,1,32], index: 7, kind: input, shape index: {}]   ;;  %s5565_s8 = inlined_call_operand.vmem [shape: f32[2,1,32], index: 8, kind: input, shape index: {}]   ;;  %s5566_s9 = inlined_call_operand.vmem [shape: f32[2,32,128], index: 9, kind: input, shape index: {}]   ;;  %s5567_s10 = inlined_call_operand.vmem [shape: f32[2,1,128], index: 10, kind: input, shape index: {}]   ;;  %s5568_s11 = inlined_call_operand.vmem [shape: f32[2,128,32], index: 11, kind: input, shape index: {}]   ;;  %s5569_s12 = inlined_call_operand.vmem [shape: f32[2,1,32], index: 12, kind: input, shape index: {}]   ;;  %s5570_s13 = inlined_call_operand.vmem [shape: f32[2,1,32], index: 13, kind: input, shape index: {}]   ;;  %s5571_s14 = inlined_call_operand.vmem [shape: f32[2,1,32], index: 14, kind: input, shape index: {}]   ;;  %s5572_s15 = inlined_call_operand.hbm [shape: f32[16,32], index: 15, kind: output, shape index: {0}]   ;;  %s5573_s16 = inlined_call_operand.hbm [shape: f32[2,4,8,8], index: 16, kind: output, shape index: {1}]   ;;  %s5574_s17 = inlined_call_operand.hbm [shape: f32[2,4,8,8], index: 17, kind: output, shape index: {2}]  }
   0x1   :  { %5581 = sst [smem:[#allocation9_spill]] %s5557_s0 }
   0x2   :  { %5582 = sst [smem:[#allocation10_spill]] %s5558_s1 }
   0x3   :  { %23 = vsyncpa [#allocation3], 0  ;;  %s5583_s26 = sld [smem:[#allocation9_spill]]  ;;  %s5584_s29 = sld [smem:[#allocation10_spill]]  ;;  %v4785_v2 = vmov 0  }
   0x4   :  { %4626 = vset.pattern.permute.xlu0 %v4785_v2 }
   0x9   :  { %v55_v0 = vld [vmem:[%s5583_s26] sm:$0xff]  ;;  %v72_v3 = vld [vmem:[%s5584_s29 + $0x8] sm:$0xff]  ;;  %v73_v4 = vld [vmem:[%s5584_s29 + $0x10] sm:$0xff] }
   0xa   :  { %v71_v1 = vld [vmem:[%s5584_s29] sm:$0xff]  ;;  %v74_v5 = vld [vmem:[%s5584_s29 + $0x18] sm:$0xff]  ;;  %60 = vperm.xlu0 %4626, %v55_v0  }
   0xb   :  { %v4491_v6 = vpack.c.bf16 %v72_v3, %v71_v1  ;;  %v4495_v7 = vpack.c.bf16 %v74_v5, %v73_v4 }
   0xc   :  { %24 = vsyncpa [#allocation5], 0  ;;  %v56_v8 = vld [vmem:[%s5583_s26 + $0x8] sm:$0xff]  ;;  %v4786_v9 = vmov 0.0   ;;  %v159_v10 = vld [vmem:[%s5560_s3] sm:$0xff]  ;;  %v57_v13 = vlaneseq  ;;  %vm77_vm0 = vcmask 261120  }
   0xd   :  { %4206 = vmatprep.subr.mxu0 %v4786_v9  ;;  %4492 = vmatprep.subr.bf16.mxu1 %v4491_v6  ;;  %v160_v11 = vld [vmem:[%s5560_s3 + $0x8] sm:$0xff]  ;;  %v161_v19 = vld [vmem:[%s5560_s3 + $0x10] sm:$0xff]  ;;  %v162_v20 = vld [vmem:[%s5560_s3 + $0x18] sm:$0xff]  ;;  %vm4787_vm3 = vmmov 0   ;;  %s4789_s22 = smov 120   ;;  %s4790_s23 = smov 112  }
   0xe   :  { %4494 = vmatpush3.bf16.msra.mxu1 %v4491_v6  ;;  %63 = vperm.xlu0 %4626, %v56_v8   ;;  %v4499_v12 = vpack.c.bf16 %v160_v11, %v159_v10  ;;  %v58_v14 = vand.u32 127, %v57_v13  ;;  %v4503_v21 = vpack.c.bf16 %v162_v20, %v161_v19  ;;  %v75_v22 = vld [vmem:[%s5559_s2] sm:$0xff]  ;;  %v76_v23 = vld [vmem:[%s5559_s2 + $0x8] sm:$0xff]  ;;  %s4788_s2 = smov 104   ;;  %s4791_s24 = smov 96   ;;  %vm267_vm4 = vcmask 64512  }
   0xf   :  { %4496 = vmatprep.subr.bf16.mxu1 %v4495_v7  ;;  %v3930_v28 = vld [vmem:[%s5561_s4] ss:$0 sm:$0xff]  ;;  %4208 = vmatprep.mubr.msk.f32.mxu0 %vm4787_vm3, %v4786_v9  ;;  %s4792_s25 = smov 64   ;;  %s4793_s27 = smov 8   ;;  %vm1613_vm5 = vcmask 130048   ;;  %vm1616_vm6 = vcmask 195584  }
  0x10   :  { %s5579_s26 = smov 16   ;;  %s5577_s28 = smov 24  }
  0x12   :  { %4498 = vmatpush3.bf16.msra.mxu1 %v4495_v7 }
  0x13   :  { %4500 = vmatprep.subr.bf16.mxu1 %v4499_v12 }
  0x89   :  { %v61_v15 = vpop.permute.xlu0 %60 }
  0x8a   :  { %vm65_vm1 = vcmp.eq.s32.totalorder %v58_v14, %v61_v15 }
  0x8b   :  { %v3926_v16 = vsel %vm65_vm1, 1.0, %v4786_v9 }
  0x8c   :  { %4192 = vmatprep.mubr.msk.f32.mxu1 %vm77_vm0, %v3926_v16 }
  0x8d   :  { %v64_v17 = vpop.permute.xlu0 %63 }
  0x8e   :  { %vm66_vm2 = vcmp.eq.s32.totalorder %v58_v14, %v64_v17 }
  0x8f   :  { %v3927_v18 = vsel %vm66_vm2, 1.0, %v4786_v9 }
  0x90   :  { %4193 = vmatmul.mubr.msk.f32.vlgmr.msra.gmra.mrb[0].mxu1 %vm77_vm0, %v3927_v18 }
  0x91   :  { %4502 = vmatpush3.bf16.msra.mxu1 %v4499_v12 }
  0x92   :  { %4504 = vmatprep.subr.bf16.mxu1 %v4503_v21 }
  0x95   :  { %4506 = vmatpush3.bf16.msra.mxu1 %v4503_v21 }
  0x96   :  { %4211 = vmatprep.subr.mxu1 %v4786_v9 }
 0x163   :  { %v4194_v24 = vpop.f32.mrb[0].mxu1 }
 0x164   :  { %v150_v25 = vpop.f32.mrb[1].mxu1  ;;  %v4934_v27 = vadd.f32 %v4194_v24, %v76_v23 }
 0x165   :  { %v4932_v26 = vadd.f32 %v150_v25, %v75_v22 }
 0x167   :  { %4203 = vmatprep.mubr.msk.f32.mxu1 %vm77_vm0, %v4932_v26 }
 0x168   :  { %4204 = vmatmul.mubr.msk.f32.vlgmr.msra.gmra.mrb[2].mxu1 %vm77_vm0, %v4934_v27 }
 0x169   :  { %4213 = vmatprep.mubr.msk.f32.mxu1 %vm4787_vm3, %v4786_v9 }
 0x23b   :  { %v4205_v29 = vpop.f32.mrb[2].mxu1 }
 0x23c   :  { %v4947_v30 = vadd.f32 %v4205_v29, %v3930_v28  ;;  %v242_v31 = vpop.f32.mrb[3].mxu1 }
 0x23d   :  { %v243_v32 = vadd.f32 %v3930_v28, %v242_v31 }
 0x23f   :  { %261 = vrot.lane.b32.xlu0 %v243_v32, %s4788_s2  ;;  %253 = vrot.lane.b32.xlu1 %v243_v32, %s4789_s22 }
 0x243   :  { %257 = vrot.lane.b32.xlu1 %v243_v32, %s4790_s23 }
 0x247   :  { %265 = vrot.lane.b32.xlu1 %v243_v32, %s4791_s24 }
 0x2b1   :  { %v254_v33 = vpop.permute.xlu1 %253  ;;  %v262_v34 = vpop.permute.xlu0 %261 }
 0x2b2   :  { %342 = vrot.lane.b32.xlu0 %v254_v33, %s4791_s24 }
 0x2b5   :  { %v258_v35 = vpop.permute.xlu1 %257 }
 0x2b6   :  { %494 = vrot.lane.b32.xlu0 %v262_v34, %s4791_s24  ;;  %418 = vrot.lane.b32.xlu1 %v258_v35, %s4791_s24 }
 0x2b9   :  { %v266_v36 = vpop.permute.xlu1 %265 }
 0x2ba   :  { %4207 = vmatpush3.xpose.msk.msra.mxu0 %vm267_vm4, %v266_v36 }
 0x2bb   :  { %4216 = vmatprep.subr.mxu0 %v4786_v9 }
 0x2bd   :  { %4209 = vmatmul.mubr.msk.f32.vlgmr.msra.gmra.mrb[0].mxu0 %vm267_vm4, %v243_v32 }
 0x2be   :  { %4218 = vmatprep.mubr.msk.f32.mxu0 %vm4787_vm3, %v4786_v9 }
 0x324   :  { %v343_v37 = vpop.permute.xlu0 %342 }
 0x325   :  { %4212 = vmatpush3.xpose.msk.msra.mxu1 %vm267_vm4, %v343_v37 }
 0x326   :  { %4221 = vmatprep.subr.mxu1 %v4786_v9 }
 0x328   :  { %4214 = vmatmul.mubr.msk.f32.vlgmr.msra.gmra.mrb[4].mxu1 %vm267_vm4, %v254_v33  ;;  %v495_v38 = vpop.permute.xlu0 %494  ;;  %v419_v39 = vpop.permute.xlu1 %418 }
 0x329   :  { %4217 = vmatpush3.xpose.msk.msra.mxu0 %vm267_vm4, %v419_v39  ;;  %4222 = vmatpush3.xpose.msk.msra.mxu1 %vm267_vm4, %v495_v38 }
 0x32a   :  { %4223 = vmatprep.mubr.msk.f32.mxu1 %vm4787_vm3, %v4786_v9  ;;  %4231 = vmatprep.subr.mxu1 %v4786_v9 }
 0x32b   :  { %4226 = vmatprep.subr.mxu0 %v4786_v9 }
 0x32c   :  { %4219 = vmatmul.mubr.msk.f32.vlgmr.msra.gmra.mrb[2].mxu0 %vm267_vm4, %v258_v35  ;;  %4224 = vmatmul.mubr.msk.f32.vlgmr.msra.gmra.mrb[6].mxu1 %vm267_vm4, %v262_v34 }
 0x32d   :  { %4228 = vmatprep.mubr.msk.f32.mxu0 %vm4787_vm3, %v4786_v9  ;;  %4233 = vmatprep.mubr.msk.f32.mxu1 %vm4787_vm3, %v4786_v9 }
 0x390   :  { %v338_v40 = vpop.f32.mrb[0].mxu0 }
 0x391   :  { %v570_v41 = vmul.f32 0.35355338, %v338_v40  ;;  %v4210_v42 = vpop.f32.mrb[1].mxu0 }
 0x393   :  { %v574_v43 = vsel %vm267_vm4, %v570_v41, -inf }
 0x394   :  { %575 = vmax.xlane.f32.xlu1 %v574_v43 }
 0x3fb   :  { %v414_v44 = vpop.f32.mrb[4].mxu1 }
 0x3fc   :  { %v571_v45 = vmul.f32 0.35355338, %v414_v44  ;;  %v4215_v46 = vpop.f32.mrb[5].mxu1 }
 0x3fe   :  { %v577_v47 = vsel %vm267_vm4, %v571_v45, -inf }
 0x3ff   :  { %578 = vmax.xlane.f32.xlu0 %v577_v47  ;;  %v490_v48 = vpop.f32.mrb[2].mxu0  ;;  %v566_v49 = vpop.f32.mrb[6].mxu1 }
 0x400   :  { %v572_v50 = vmul.f32 0.35355338, %v490_v48  ;;  %v573_v51 = vmul.f32 0.35355338, %v566_v49  ;;  %v4220_v52 = vpop.f32.mrb[3].mxu0  ;;  %v4225_v53 = vpop.f32.mrb[7].mxu1 }
 0x402   :  { %v583_v54 = vsel %vm267_vm4, %v573_v51, -inf  ;;  %v580_v55 = vsel %vm267_vm4, %v572_v50, -inf }
 0x403   :  { %584 = vmax.xlane.f32.xlu1 %v583_v54  ;;  %581 = vmax.xlane.f32.xlu0 %v580_v55 }
 0x414   :  { %259 = vrot.lane.b32.xlu1 %v4947_v30, %s4790_s23 }
 0x418   :  { %263 = vrot.lane.b32.xlu1 %v4947_v30, %s4788_s2 }
 0x419   :  { %255 = vrot.lane.b32.xlu0 %v4947_v30, %s4789_s22 }
 0x41c   :  { %622 = vrot.lane.b32.xlu1 %v243_v32, %s4792_s25 }
 0x41d   :  { %698 = vrot.lane.b32.xlu0 %v254_v33, %s4792_s25 }
 0x420   :  { %774 = vrot.lane.b32.xlu1 %v258_v35, %s4792_s25 }
 0x421   :  { %926 = vrot.lane.b32.xlu0 %v4947_v30, %s4791_s24  ;;  %v576_v56 = vpop.xlane.xlu1 %575 }
 0x422   :  { %v586_v57 = vsub.f32 %v570_v41, %v576_v56 }
 0x424   :  { %850 = vrot.lane.b32.xlu1 %v262_v34, %s4792_s25  ;;  %v590_v58 = vmul.f32 1.442695, %v586_v57 }
 0x426   :  { %4627 = vpow2.f32 %v590_v58 }
 0x430   :  { %v4628_v59 = vpop.eup %4627 }
 0x431   :  { %v598_v60 = vsel %vm267_vm4, %v4628_v59, 0.0 }
 0x440   :  { %599 = vadd.xlane.f32.xlu0 %v598_v60 }
 0x48c   :  { %v579_v61 = vpop.xlane.xlu0 %578 }
 0x48d   :  { %v587_v62 = vsub.f32 %v571_v45, %v579_v61 }
 0x48f   :  { %v592_v63 = vmul.f32 1.442695, %v587_v62 }
 0x490   :  { %v582_v0 = vpop.xlane.xlu0 %581  ;;  %v585_v1 = vpop.xlane.xlu1 %584 }
 0x491   :  { %4629 = vpow2.f32 %v592_v63  ;;  %v588_v2 = vsub.f32 %v572_v50, %v582_v0  ;;  %v589_v3 = vsub.f32 %v573_v51, %v585_v1 }
 0x493   :  { %v594_v4 = vmul.f32 1.442695, %v588_v2  ;;  %v596_v5 = vmul.f32 1.442695, %v589_v3 }
 0x494   :  { %v4993_v6 = vpop.permute.xlu0 %255  ;;  %v4995_v7 = vpop.permute.xlu1 %259 }
 0x495   :  { %4631 = vpow2.f32 %v594_v4 }
 0x496   :  { %4633 = vpow2.f32 %v596_v5 }
 0x498   :  { %v699_v8 = vpop.permute.xlu0 %698  ;;  %v4997_v10 = vpop.permute.xlu1 %263 }
 0x499   :  { %4232 = vmatpush3.msra.mxu1 %v699_v8 }
 0x49a   :  { %4241 = vmatprep.subr.mxu1 %v4786_v9 }
 0x49b   :  { %v4630_v11 = vpop.eup %4629 }
 0x49c   :  { %v623_v12 = vpop.permute.xlu1 %622  ;;  %v601_v13 = vsel %vm267_vm4, %v4630_v11, 0.0  ;;  %v927_v18 = vpop.permute.xlu0 %926 }
 0x49d   :  { %602 = vadd.xlane.f32.xlu1 %v601_v13  ;;  %4227 = vmatpush3.msra.mxu0 %v623_v12 }
 0x49e   :  { %4236 = vmatprep.subr.mxu0 %v4786_v9 }
 0x49f   :  { %v4632_v14 = vpop.eup %4631 }
 0x4a0   :  { %v604_v15 = vsel %vm267_vm4, %v4632_v14, 0.0  ;;  %v4634_v16 = vpop.eup %4633  ;;  %v775_v22 = vpop.permute.xlu1 %774 }
 0x4a1   :  { %605 = vadd.xlane.f32.xlu0 %v604_v15  ;;  %v607_v17 = vsel %vm267_vm4, %v4634_v16, 0.0 }
 0x4a4   :  { %v851_v23 = vpop.permute.xlu1 %850 }
 0x4a5   :  { %608 = vadd.xlane.f32.xlu0 %v607_v17 }
 0x4ae   :  { %1002 = vrot.lane.b32.xlu1 %v4993_v6, %s4791_s24 }
 0x4b2   :  { %1154 = vrot.lane.b32.xlu1 %v4997_v10, %s4791_s24 }
 0x4bb   :  { %1078 = vrot.lane.b32.xlu0 %v4995_v7, %s4791_s24 }
 0x4cd   :  { %v600_v19 = vpop.xlane.xlu0 %599 }
 0x4ce   :  { %4635 = vrcp.f32 %v600_v19 }
 0x4d8   :  { %v4636_v20 = vpop.eup %4635 }
 0x4d9   :  { %v611_v21 = vmul.f32 %v4636_v20, %v4628_v59 }
 0x4db   :  { %618 = vst.msk [vmem:[#allocation4] sm:$0xff] %vm267_vm4, %v611_v21  ;;  %4229 = vmatmul.mubr.msk.f32.vlgmr.msra.gmra.mrb[4].mxu0 %vm267_vm4, %v611_v21 }
 0x4dc   :  { %4237 = vmatpush3.msra.mxu0 %v775_v22  ;;  %4238 = vmatprep.mubr.msk.f32.mxu0 %vm4787_vm3, %v4786_v9 }
 0x4dd   :  { %4246 = vmatprep.subr.mxu0 %v4786_v9 }
 0x52a   :  { %v603_v24 = vpop.xlane.xlu1 %602 }
 0x52b   :  { %4637 = vrcp.f32 %v603_v24 }
 0x52e   :  { %v606_v25 = vpop.xlane.xlu0 %605  ;;  %v1003_v35 = vpop.permute.xlu1 %1002 }
 0x52f   :  { %4639 = vrcp.f32 %v606_v25 }
 0x532   :  { %v609_v28 = vpop.xlane.xlu0 %608  ;;  %v1155_v38 = vpop.permute.xlu1 %1154 }
 0x533   :  { %4641 = vrcp.f32 %v609_v28 }
 0x535   :  { %v4638_v29 = vpop.eup %4637 }
 0x536   :  { %v613_v31 = vmul.f32 %v4638_v29, %v4630_v11  ;;  %v1079_v37 = vpop.permute.xlu0 %1078 }
 0x538   :  { %619 = vst.msk [vmem:[#allocation4 + $0x8] sm:$0xff] %vm267_vm4, %v613_v31  ;;  %4234 = vmatmul.mubr.msk.f32.vlgmr.msra.gmra.mrb[8].mxu1 %vm267_vm4, %v613_v31 }
 0x539   :  { %v4640_v32 = vpop.eup %4639  ;;  %4242 = vmatpush3.msra.mxu1 %v851_v23  ;;  %4243 = vmatprep.mubr.msk.f32.mxu1 %vm4787_vm3, %v4786_v9 }
 0x53a   :  { %v615_v33 = vmul.f32 %v4640_v32, %v4632_v14  ;;  %4251 = vmatprep.subr.mxu1 %v4786_v9 }
 0x53c   :  { %620 = vst.msk [vmem:[#allocation4 + $0x10] sm:$0xff] %vm267_vm4, %v615_v33  ;;  %4239 = vmatmul.mubr.msk.f32.vlgmr.msra.gmra.mrb[6].mxu0 %vm267_vm4, %v615_v33 }
 0x53d   :  { %v4642_v34 = vpop.eup %4641  ;;  %4247 = vmatpush3.xpose.msk.msra.mxu0 %vm267_vm4, %v927_v18  ;;  %4248 = vmatprep.mubr.msk.f32.mxu0 %vm4787_vm3, %v4786_v9 }
 0x53e   :  { %v617_v36 = vmul.f32 %v4642_v34, %v4634_v16  ;;  %4256 = vmatprep.subr.mxu0 %v4786_v9 }
 0x540   :  { %621 = vst.msk [vmem:[#allocation4 + $0x18] sm:$0xff] %vm267_vm4, %v617_v36  ;;  %4244 = vmatmul.mubr.msk.f32.vlgmr.msra.gmra.mrb[10].mxu1 %vm267_vm4, %v617_v36  ;;  %4249 = vmatmul.mubr.msk.f32.vlgmr.msra.gmra.mrb[8].mxu0 %vm267_vm4, %v4947_v30 }
 0x541   :  { %4252 = vmatpush3.xpose.msk.msra.mxu1 %vm267_vm4, %v1003_v35  ;;  %4257 = vmatpush3.xpose.msk.msra.mxu0 %vm267_vm4, %v1079_v37 }
 0x542   :  { %4253 = vmatprep.mubr.msk.f32.mxu1 %vm4787_vm3, %v4786_v9  ;;  %4258 = vmatprep.mubr.msk.f32.mxu0 %vm4787_vm3, %v4786_v9 }
 0x543   :  { %4261 = vmatprep.subr.mxu1 %v4786_v9  ;;  %4266 = vmatprep.subr.mxu0 %v4786_v9 }
 0x544   :  { %4254 = vmatmul.mubr.msk.f32.vlgmr.msra.gmra.mrb[12].mxu1 %vm267_vm4, %v4993_v6  ;;  %4259 = vmatmul.mubr.msk.f32.vlgmr.msra.gmra.mrb[10].mxu0 %vm267_vm4, %v4995_v7 }
 0x545   :  { %4262 = vmatpush3.xpose.msk.msra.mxu1 %vm267_vm4, %v1155_v38  ;;  %4263 = vmatprep.mubr.msk.f32.mxu1 %vm4787_vm3, %v4786_v9 }
 0x546   :  { %4271 = vmatprep.subr.mxu1 %v4786_v9  ;;  %4268 = vmatprep.mubr.msk.f32.mxu0 %vm4787_vm3, %v4786_v9 }
 0x548   :  { %4264 = vmatmul.mubr.msk.f32.vlgmr.msra.gmra.mrb[14].mxu1 %vm267_vm4, %v4997_v10 }
 0x549   :  { %4273 = vmatprep.mubr.msk.f32.mxu1 %vm4787_vm3, %v4786_v9 }
 0x5ae   :  { %v5052_v39 = vpop.f32.mrb[4].mxu0 }
 0x5af   :  { %v4230_v40 = vpop.f32.mrb[5].mxu0 }
 0x60b   :  { %v770_v41 = vpop.f32.mrb[8].mxu1 }
 0x60c   :  { %v4235_v42 = vpop.f32.mrb[9].mxu1 }
 0x60f   :  { %v846_v43 = vpop.f32.mrb[6].mxu0 }
 0x610   :  { %v4240_v44 = vpop.f32.mrb[7].mxu0 }
 0x613   :  { %v922_v45 = vpop.f32.mrb[10].mxu1  ;;  %v998_v46 = vpop.f32.mrb[8].mxu0 }
 0x614   :  { %v1230_v47 = vmul.f32 0.35355338, %v998_v46  ;;  %v4245_v48 = vpop.f32.mrb[11].mxu1  ;;  %v4250_v49 = vpop.f32.mrb[9].mxu0  ;;  %v1620_v46 = vld [vmem:[%s5562_s5 + $0x8] sm:$0xff] }
 0x615   :  { %v1622_v48 = vld [vmem:[%s5562_s5 + $0x18] sm:$0xff] }
 0x616   :  { %v1234_v50 = vsel %vm267_vm4, %v1230_v47, -inf }
 0x617   :  { %1235 = vmax.xlane.f32.xlu0 %v1234_v50  ;;  %v1074_v51 = vpop.f32.mrb[12].mxu1  ;;  %v1150_v52 = vpop.f32.mrb[10].mxu0 }
 0x618   :  { %v1231_v53 = vmul.f32 0.35355338, %v1074_v51  ;;  %v1232_v54 = vmul.f32 0.35355338, %v1150_v52  ;;  %v4255_v55 = vpop.f32.mrb[13].mxu1  ;;  %v4260_v56 = vpop.f32.mrb[11].mxu0 }
 0x61a   :  { %v1240_v57 = vsel %vm267_vm4, %v1232_v54, -inf  ;;  %v1237_v58 = vsel %vm267_vm4, %v1231_v53, -inf }
 0x61b   :  { %1241 = vmax.xlane.f32.xlu0 %v1240_v57  ;;  %1238 = vmax.xlane.f32.xlu1 %v1237_v58  ;;  %v1226_v59 = vpop.f32.mrb[14].mxu1 }
 0x61c   :  { %v1233_v60 = vmul.f32 0.35355338, %v1226_v59  ;;  %v4265_v61 = vpop.f32.mrb[15].mxu1 }
 0x61e   :  { %v1243_v62 = vsel %vm267_vm4, %v1233_v60, -inf }
 0x61f   :  { %1244 = vmax.xlane.f32.xlu0 %v1243_v62 }
 0x62c   :  { %1283 = vrot.lane.b32.xlu1 %v4947_v30, %s4792_s25 }
 0x6a4   :  { %v1236_v63 = vpop.xlane.xlu0 %1235 }
 0x6a5   :  { %v1246_v0 = vsub.f32 %v1230_v47, %v1236_v63 }
 0x6a7   :  { %v1250_v1 = vmul.f32 1.442695, %v1246_v0  ;;  %v3957_v0 = vld [vmem:[%s5563_s6] ss:$0 sm:$0xff] }
 0x6a8   :  { %v1242_v2 = vpop.xlane.xlu0 %1241  ;;  %v1239_v3 = vpop.xlane.xlu1 %1238 }
 0x6a9   :  { %4643 = vpow2.f32 %v1250_v1  ;;  %v1248_v4 = vsub.f32 %v1232_v54, %v1242_v2  ;;  %v1247_v5 = vsub.f32 %v1231_v53, %v1239_v3 }
 0x6ab   :  { %v1254_v8 = vmul.f32 1.442695, %v1248_v4  ;;  %v1252_v11 = vmul.f32 1.442695, %v1247_v5 }
 0x6ac   :  { %v1245_v12 = vpop.xlane.xlu0 %1244  ;;  %v1284_v13 = vpop.permute.xlu1 %1283 }
 0x6ad   :  { %4645 = vpow2.f32 %v1254_v8  ;;  %v1249_v14 = vsub.f32 %v1233_v60, %v1245_v12  ;;  %4267 = vmatpush3.msra.mxu0 %v1284_v13 }
 0x6ae   :  { %4647 = vpow2.f32 %v1252_v11  ;;  %4276 = vmatprep.subr.mxu0 %v4786_v9 }
 0x6af   :  { %v1256_v15 = vmul.f32 1.442695, %v1249_v14 }
 0x6b1   :  { %4649 = vpow2.f32 %v1256_v15 }
 0x6b3   :  { %v4644_v30 = vpop.eup %4643 }
 0x6b4   :  { %v1258_v16 = vsel %vm267_vm4, %v4644_v30, 0.0 }
 0x6b5   :  { %1259 = vadd.xlane.f32.xlu1 %v1258_v16 }
 0x6b7   :  { %v4646_v17 = vpop.eup %4645 }
 0x6b8   :  { %v4648_v18 = vpop.eup %4647  ;;  %v1264_v19 = vsel %vm267_vm4, %v4646_v17, 0.0 }
 0x6b9   :  { %1265 = vadd.xlane.f32.xlu1 %v1264_v19  ;;  %v1261_v20 = vsel %vm267_vm4, %v4648_v18, 0.0 }
 0x6ba   :  { %1262 = vadd.xlane.f32.xlu0 %v1261_v20 }
 0x6bb   :  { %v4650_v21 = vpop.eup %4649 }
 0x6bc   :  { %v1267_v22 = vsel %vm267_vm4, %v4650_v21, 0.0 }
 0x6be   :  { %1268 = vadd.xlane.f32.xlu0 %v1267_v22 }
 0x6ca   :  { %1435 = vrot.lane.b32.xlu1 %v4995_v7, %s4792_s25 }
 0x6ce   :  { %1511 = vrot.lane.b32.xlu1 %v4997_v10, %s4792_s25 }
 0x6d4   :  { %1359 = vrot.lane.b32.xlu0 %v4993_v6, %s4792_s25 }
 0x6d8   :  { %1589 = vrot.lane.b32.xlu0 %v770_v41, %s4793_s27 }
 0x6dc   :  { %1597 = vrot.lane.b32.xlu0 %v846_v43, %s5579_s26 }
 0x6e0   :  { %1605 = vrot.lane.b32.xlu0 %v922_v45, %s5577_s28  ;;  %v1619_v45 = vld [vmem:[%s5562_s5] sm:$0xff] }
 0x6e1   :  { %v4507_v47 = vpack.c.bf16 %v1620_v46, %v1619_v45  ;;  %v1870_v46 = vld [vmem:[%s5568_s11 + $0x10] sm:$0xff] }
 0x742   :  { %v1260_v23 = vpop.xlane.xlu1 %1259 }
 0x743   :  { %4651 = vrcp.f32 %v1260_v23  ;;  %v1760_v23 = vld [vmem:[%s5566_s9 + $0x10] sm:$0xff] }
 0x746   :  { %v1266_v24 = vpop.xlane.xlu1 %1265 }
 0x747   :  { %v1263_v25 = vpop.xlane.xlu0 %1262  ;;  %4653 = vrcp.f32 %v1266_v24  ;;  %v1761_v24 = vld [vmem:[%s5566_s9 + $0x18] sm:$0xff] }
 0x748   :  { %4655 = vrcp.f32 %v1263_v25  ;;  %v4519_v25 = vpack.c.bf16 %v1761_v24, %v1760_v23 }
 0x74a   :  { %v1436_v6 = vpop.permute.xlu1 %1435 }
 0x74b   :  { %v1269_v7 = vpop.xlane.xlu0 %1268 }
 0x74c   :  { %4657 = vrcp.f32 %v1269_v7  ;;  %v1868_v7 = vld [vmem:[%s5568_s11] sm:$0xff] }
 0x74d   :  { %v4652_v10 = vpop.eup %4651 }
 0x74e   :  { %v1271_v28 = vmul.f32 %v4652_v10, %v4644_v30  ;;  %v1512_v36 = vpop.permute.xlu1 %1511  ;;  %v1869_v10 = vld [vmem:[%s5568_s11 + $0x8] sm:$0xff] }
 0x74f   :  { %v1360_v29 = vpop.permute.xlu0 %1359 }
 0x750   :  { %1279 = vst.msk [vmem:[#allocation4 + $0x20] sm:$0xff] %vm267_vm4, %v1271_v28  ;;  %4272 = vmatpush3.msra.mxu1 %v1360_v29  ;;  %4269 = vmatmul.mubr.msk.f32.vlgmr.msra.gmra.mrb[12].mxu0 %vm267_vm4, %v1271_v28  ;;  %v4523_v28 = vpack.c.bf16 %v1869_v10, %v1868_v7  ;;  %v3965_v7 = vld [vmem:[%s5569_s12] ss:$0 sm:$0xff] }
 0x751   :  { %v4654_v31 = vpop.eup %4653  ;;  %4277 = vmatpush3.msra.mxu0 %v1436_v6  ;;  %4278 = vmatprep.mubr.msk.f32.mxu0 %vm4787_vm3, %v4786_v9 }
 0x752   :  { %v4656_v32 = vpop.eup %4655  ;;  %v1275_v33 = vmul.f32 %v4654_v31, %v4646_v17  ;;  %4281 = vmatprep.subr.mxu1 %v4786_v9  ;;  %4524 = vmatprep.subr.bf16.mxu0 %v4523_v28 }
 0x753   :  { %v1273_v34 = vmul.f32 %v4656_v32, %v4648_v18  ;;  %v1590_v35 = vpop.permute.xlu0 %1589 }
 0x754   :  { %1281 = vst.msk [vmem:[#allocation4 + $0x30] sm:$0xff] %vm267_vm4, %v1275_v33  ;;  %4279 = vmatmul.mubr.msk.f32.vlgmr.msra.gmra.mrb[14].mxu0 %vm267_vm4, %v1275_v33  ;;  %v1611_v41 = vsel %vm267_vm4, %v5052_v39, %v1590_v35  ;;  %v1621_v39 = vld [vmem:[%s5562_s5 + $0x10] sm:$0xff] }
 0x755   :  { %1280 = vst.msk [vmem:[#allocation4 + $0x28] sm:$0xff] %vm267_vm4, %v1273_v34  ;;  %4274 = vmatmul.mubr.msk.f32.vlgmr.msra.gmra.mrb[16].mxu1 %vm267_vm4, %v1273_v34  ;;  %v4511_v49 = vpack.c.bf16 %v1622_v48, %v1621_v39  ;;  %4526 = vmatpush3.bf16.msra.mxu0 %v4523_v28  ;;  %v1872_v48 = vld [vmem:[%s5568_s11 + $0x20] sm:$0xff] }
 0x756   :  { %v4658_v37 = vpop.eup %4657  ;;  %4282 = vmatpush3.msra.mxu1 %v1512_v36  ;;  %4283 = vmatprep.mubr.msk.f32.mxu1 %vm4787_vm3, %v4786_v9  ;;  %v3960_v36 = vld [vmem:[%s5564_s7] ss:$0 sm:$0xff] }
 0x757   :  { %v1277_v38 = vmul.f32 %v4658_v37, %v4650_v21  ;;  %v1598_v40 = vpop.permute.xlu0 %1597  ;;  %4508 = vmatprep.subr.bf16.mxu1 %v4507_v47  ;;  %v1759_v21 = vld [vmem:[%s5566_s9 + $0x8] sm:$0xff] }
 0x758   :  { %v1614_v42 = vsel %vm1613_vm5, %v1611_v41, %v1598_v40 }
 0x759   :  { %1282 = vst.msk [vmem:[#allocation4 + $0x38] sm:$0xff] %vm267_vm4, %v1277_v38  ;;  %4284 = vmatmul.mubr.msk.f32.vlgmr.msra.gmra.mrb[18].mxu1 %vm267_vm4, %v1277_v38  ;;  %v3961_v38 = vld [vmem:[%s5565_s8] ss:$0 sm:$0xff] }
 0x75a   :  { %4510 = vmatpush3.bf16.msra.mxu1 %v4507_v47  ;;  %v1871_v47 = vld [vmem:[%s5568_s11 + $0x18] sm:$0xff] }
 0x75b   :  { %v1606_v43 = vpop.permute.xlu0 %1605  ;;  %4512 = vmatprep.subr.bf16.mxu1 %v4511_v49  ;;  %v4527_v39 = vpack.c.bf16 %v1871_v47, %v1870_v46 }
 0x75c   :  { %v1617_v44 = vsel %vm1616_vm6, %v1614_v42, %v1606_v43 }
 0x75d   :  { %4294 = vmatprep.mubr.msk.f32.mxu1 %vm77_vm0, %v1617_v44  ;;  %4528 = vmatprep.subr.bf16.mxu0 %v4527_v39 }
 0x75e   :  { %4514 = vmatpush3.bf16.msra.mxu1 %v4511_v49  ;;  %4530 = vmatpush3.bf16.msra.mxu0 %v4527_v39  ;;  %v1873_v49 = vld [vmem:[%s5568_s11 + $0x28] sm:$0xff]  ;;  %v3968_v39 = vld [vmem:[%s5560_s3 + $0x20] sm:$0xff] }
 0x823   :  { %v1355_v50 = vpop.f32.mrb[12].mxu0 }
 0x824   :  { %v4270_v51 = vpop.f32.mrb[13].mxu0 }
 0x825   :  { %v1874_v51 = vld [vmem:[%s5568_s11 + $0x30] sm:$0xff] }
 0x827   :  { %v1507_v52 = vpop.f32.mrb[14].mxu0 }
 0x828   :  { %v1431_v53 = vpop.f32.mrb[16].mxu1  ;;  %1599 = vrot.lane.b32.xlu1 %v1507_v52, %s5579_s26  ;;  %v4280_v54 = vpop.f32.mrb[15].mxu0  ;;  %v1875_v52 = vld [vmem:[%s5568_s11 + $0x38] sm:$0xff] }
 0x829   :  { %v4275_v55 = vpop.f32.mrb[17].mxu1  ;;  %v4535_v54 = vpack.c.bf16 %v1875_v52, %v1874_v51  ;;  %v3971_v51 = vld [vmem:[%s5560_s3 + $0x38] sm:$0xff] }
 0x82a   :  { %v1877_v55 = vld [vmem:[%s5568_s11 + $0x48] sm:$0xff] }
 0x82c   :  { %v1583_v56 = vpop.f32.mrb[18].mxu1  ;;  %1591 = vrot.lane.b32.xlu1 %v1431_v53, %s4793_s27  ;;  %v1876_v53 = vld [vmem:[%s5568_s11 + $0x40] sm:$0xff] }
 0x82d   :  { %v4285_v57 = vpop.f32.mrb[19].mxu1 }
 0x82e   :  { %v1878_v57 = vld [vmem:[%s5568_s11 + $0x50] sm:$0xff] }
 0x830   :  { %1607 = vrot.lane.b32.xlu1 %v1583_v56, %s5577_s28  ;;  %v4539_v56 = vpack.c.bf16 %v1877_v55, %v1876_v53 }
 0x89a   :  { %v1600_v58 = vpop.permute.xlu1 %1599 }
 0x89e   :  { %v1592_v59 = vpop.permute.xlu1 %1591 }
 0x89f   :  { %v1612_v60 = vsel %vm267_vm4, %v1355_v50, %v1592_v59  ;;  %v4531_v50 = vpack.c.bf16 %v1873_v49, %v1872_v48  ;;  %v3969_v48 = vld [vmem:[%s5560_s3 + $0x28] sm:$0xff]  ;;  %v3970_v49 = vld [vmem:[%s5560_s3 + $0x30] sm:$0xff] }
 0x8a0   :  { %v1615_v61 = vsel %vm1613_vm5, %v1612_v60, %v1600_v58  ;;  %v1879_v58 = vld [vmem:[%s5568_s11 + $0x58] sm:$0xff]  ;;  %v1880_v60 = vld [vmem:[%s5568_s11 + $0x60] sm:$0xff]  ;;  %v4559_v52 = vpack.c.bf16 %v3971_v51, %v3970_v49 }
 0x8a1   :  { %4532 = vmatprep.subr.bf16.mxu0 %v4531_v50  ;;  %v4543_v59 = vpack.c.bf16 %v1879_v58, %v1878_v57 }
 0x8a2   :  { %v1608_v62 = vpop.permute.xlu1 %1607  ;;  %4534 = vmatpush3.bf16.msra.mxu0 %v4531_v50  ;;  %v4555_v50 = vpack.c.bf16 %v3969_v48, %v3968_v39 }
 0x8a3   :  { %v1618_v63 = vsel %vm1616_vm6, %v1615_v61, %v1608_v62  ;;  %4536 = vmatprep.subr.bf16.mxu0 %v4535_v54  ;;  %v1881_v61 = vld [vmem:[%s5568_s11 + $0x68] sm:$0xff] }
 0x8a4   :  { %4295 = vmatmul.mubr.msk.f32.vlgmr.msra.gmra.mrb[20].mxu1 %vm77_vm0, %v1618_v63  ;;  %v4547_v62 = vpack.c.bf16 %v1881_v61, %v1880_v60  ;;  %v1882_v63 = vld [vmem:[%s5568_s11 + $0x70] sm:$0xff]  ;;  %v3966_v60 = vld [vmem:[%s5570_s13] ss:$0 sm:$0xff] }
 0x8a6   :  { %4538 = vmatpush3.bf16.msra.mxu0 %v4535_v54 }
 0x8a7   :  { %4540 = vmatprep.subr.bf16.mxu0 %v4539_v56 }
 0x8aa   :  { %4542 = vmatpush3.bf16.msra.mxu0 %v4539_v56 }
 0x8ab   :  { %4544 = vmatprep.subr.bf16.mxu0 %v4543_v59 }
 0x8ae   :  { %4546 = vmatpush3.bf16.msra.mxu0 %v4543_v59 }
 0x8af   :  { %4548 = vmatprep.subr.bf16.mxu0 %v4547_v62 }
 0x8b2   :  { %4550 = vmatpush3.bf16.msra.mxu0 %v4547_v62 }
 0x977   :  { %v4296_v1 = vpop.f32.mrb[20].mxu1 }
 0x978   :  { %v1708_v2 = vadd.f32 %v4296_v1, %v3957_v0  ;;  %v1702_v3 = vpop.f32.mrb[21].mxu1 }
 0x979   :  { %v1703_v4 = vadd.f32 %v3957_v0, %v1702_v3  ;;  %v1883_v0 = vld [vmem:[%s5568_s11 + $0x78] sm:$0xff] }
 0x97a   :  { %v1712_v5 = vadd.f32 %v1708_v2, %v4934_v27  ;;  %v4551_v1 = vpack.c.bf16 %v1883_v0, %v1882_v63  ;;  %v3962_v2 = vld [vmem:[%s5567_s10] ss:$0 sm:$0xff] }
 0x97b   :  { %v1711_v8 = vadd.f32 %v1703_v4, %v4932_v26  ;;  %v1758_v26 = vld [vmem:[%s5566_s9] sm:$0xff] }
 0x97c   :  { %v1718_v11 = vsel %vm77_vm0, %v1712_v5, 0.0  ;;  %v4515_v22 = vpack.c.bf16 %v1759_v21, %v1758_v26  ;;  %4552 = vmatprep.subr.bf16.mxu0 %v4551_v1  ;;  %v3967_v0 = vld [vmem:[%s5571_s14] ss:$0 sm:$0xff] }
 0x97d   :  { %1719 = vadd.xlane.f32.xlu1 %v1718_v11  ;;  %v1715_v12 = vsel %vm77_vm0, %v1711_v8, 0.0  ;;  %4554 = vmatpush3.bf16.msra.mxu0 %v4551_v1 }
 0x97e   :  { %1716 = vadd.xlane.f32.xlu0 %v1715_v12  ;;  %4516 = vmatprep.subr.bf16.mxu1 %v4515_v22 }
 0x97f   :  { %4518 = vmatpush3.bf16.msra.mxu1 %v4515_v22  ;;  %4384 = vmatprep.subr.mxu0 %v4786_v9 }
 0x980   :  { %4520 = vmatprep.subr.bf16.mxu1 %v4519_v25 }
 0x983   :  { %4522 = vmatpush3.bf16.msra.mxu1 %v4519_v25 }
 0x984   :  { %4556 = vmatprep.subr.bf16.mxu1 %v4555_v50 }
 0xa0a   :  { %v1720_v13 = vpop.xlane.xlu1 %1719 }
 0xa0b   :  { %v1723_v14 = vmul.f32 0.03125, %v1720_v13  ;;  %v1717_v15 = vpop.xlane.xlu0 %1716 }
 0xa0c   :  { %v1722_v30 = vmul.f32 0.03125, %v1717_v15 }
 0xa0d   :  { %v1725_v16 = vsub.f32 %v1712_v5, %v1723_v14 }
 0xa0e   :  { %v1724_v17 = vsub.f32 %v1711_v8, %v1722_v30 }
 0xa0f   :  { %v1727_v20 = vmul.f32 %v1725_v16, %v1725_v16 }
 0xa10   :  { %v1726_v18 = vmul.f32 %v1724_v17, %v1724_v17 }
 0xa11   :  { %v1731_v27 = vsel %vm77_vm0, %v1727_v20, 0.0 }
 0xa12   :  { %v1728_v19 = vsel %vm77_vm0, %v1726_v18, 0.0 }
 0xa13   :  { %1729 = vadd.xlane.f32.xlu0 %v1728_v19 }
 0xa17   :  { %1732 = vadd.xlane.f32.xlu0 %v1731_v27 }
 0xaa0   :  { %v1730_v6 = vpop.xlane.xlu0 %1729 }
 0xaa1   :  { %v1734_v29 = vmul.f32 0.03125, %v1730_v6 }
 0xaa3   :  { %v1736_v31 = vadd.f32 1e-05, %v1734_v29 }
 0xaa4   :  { %v1733_v32 = vpop.xlane.xlu0 %1732 }
 0xaa5   :  { %4659 = vrsqrt.f32 %v1736_v31  ;;  %v1735_v33 = vmul.f32 0.03125, %v1733_v32 }
 0xaa7   :  { %v1737_v34 = vadd.f32 1e-05, %v1735_v33 }
 0xaa9   :  { %4661 = vrsqrt.f32 %v1737_v34 }
 0xaaf   :  { %v4660_v35 = vpop.eup %4659 }
 0xab0   :  { %v1740_v37 = vmul.f32 %v4660_v35, %v1724_v17 }
 0xab2   :  { %v1748_v40 = vmul.f32 %v3960_v36, %v1740_v37 }
 0xab3   :  { %v4662_v41 = vpop.eup %4661 }
 0xab4   :  { %v1741_v42 = vmul.f32 %v4662_v41, %v1725_v16  ;;  %v5144_v43 = vadd.f32 %v3961_v38, %v1748_v40 }
 0xab6   :  { %v1749_v44 = vmul.f32 %v3960_v36, %v1741_v42  ;;  %4305 = vmatprep.mubr.msk.f32.mxu1 %vm77_vm0, %v5144_v43 }
 0xab8   :  { %v5148_v45 = vadd.f32 %v3961_v38, %v1749_v44 }
 0xaba   :  { %4306 = vmatmul.mubr.msk.f32.vlgmr.msra.gmra.mrb[22].mxu1 %vm77_vm0, %v5148_v45 }
 0xabb   :  { %4558 = vmatpush3.bf16.msra.mxu1 %v4555_v50 }
 0xabc   :  { %4560 = vmatprep.subr.bf16.mxu1 %v4559_v52 }
 0xabf   :  { %4562 = vmatpush3.bf16.msra.mxu1 %v4559_v52 }
 0xac0   :  { %4354 = vmatprep.subr.mxu1 %v4786_v9 }
 0xb8d   :  { %v4307_v3 = vpop.f32.mrb[22].mxu1 }
 0xb8e   :  { %v1847_v4 = vadd.f32 %v4307_v3, %v3962_v2  ;;  %v1841_v5 = vpop.f32.mrb[23].mxu1 }
 0xb8f   :  { %v1842_v8 = vadd.f32 %v3962_v2, %v1841_v5 }
 0xb90   :  { %v1853_v11 = vmul.f32 0.044715, %v1847_v4  ;;  %v1851_v23 = vmul.f32 0.5, %v1847_v4 }
 0xb91   :  { %v1852_v12 = vmul.f32 0.044715, %v1842_v8  ;;  %v1850_v21 = vmul.f32 0.5, %v1842_v8 }
 0xb92   :  { %v1855_v13 = vmul.f32 %v1853_v11, %v1847_v4  ;;  %v3973_v11 = vld [vmem:[%s5561_s4 + $0x1] ss:$0 sm:$0xff]  ;;  %s5585_s4 = smov 16  }
 0xb93   :  { %v1854_v14 = vmul.f32 %v1852_v12, %v1842_v8 }
 0xb94   :  { %v1857_v15 = vmul.f32 %v1855_v13, %v1847_v4 }
 0xb95   :  { %v1856_v30 = vmul.f32 %v1854_v14, %v1842_v8 }
 0xb96   :  { %v1859_v16 = vadd.f32 %v1857_v15, %v1847_v4 }
 0xb97   :  { %v1858_v17 = vadd.f32 %v1856_v30, %v1842_v8 }
 0xb98   :  { %v1861_v18 = vmul.f32 0.7978846, %v1859_v16 }
 0xb99   :  { %v1860_v19 = vmul.f32 0.7978846, %v1858_v17 }
 0xb9a   :  { %4663 = vtanh.f32 %v1861_v18 }
 0xb9b   :  { %4665 = vtanh.f32 %v1860_v19 }
 0xba4   :  { %v4664_v20 = vpop.eup %4663 }
 0xba5   :  { %v4666_v27 = vpop.eup %4665  ;;  %v1865_v26 = vadd.f32 1.0, %v4664_v20 }
 0xba6   :  { %v1864_v22 = vadd.f32 1.0, %v4666_v27 }
 0xba7   :  { %v1867_v25 = vmul.f32 %v1865_v26, %v1851_v23 }
 0xba8   :  { %v1866_v24 = vmul.f32 %v1864_v22, %v1850_v21 }
 0xbaa   :  { %4340 = vmatprep.mubr.f32.mxu0 %v1866_v24 }
 0xbab   :  { %4341 = vmatmul.mubr.f32.vlgmr.msra.gmra.mrb[16].mxu0 %v1867_v25 }
 0xbac   :  { %4386 = vmatprep.mubr.msk.f32.mxu0 %vm4787_vm3, %v4786_v9 }
 0xc7e   :  { %v4342_v10 = vpop.f32.mrb[16].mxu0 }
 0xc7f   :  { %v1963_v28 = vadd.f32 %v4342_v10, %v3965_v7  ;;  %v1957_v6 = vpop.f32.mrb[17].mxu0 }
 0xc80   :  { %v1958_v29 = vadd.f32 %v3965_v7, %v1957_v6 }
 0xc81   :  { %v1967_v31 = vadd.f32 %v1963_v28, %v5148_v45 }
 0xc82   :  { %v1966_v32 = vadd.f32 %v1958_v29, %v5144_v43 }
 0xc83   :  { %v1973_v33 = vsel %vm77_vm0, %v1967_v31, 0.0 }
 0xc84   :  { %1974 = vadd.xlane.f32.xlu0 %v1973_v33  ;;  %v1970_v34 = vsel %vm77_vm0, %v1966_v32, 0.0 }
 0xc85   :  { %1971 = vadd.xlane.f32.xlu1 %v1970_v34 }
 0xd11   :  { %v1975_v35 = vpop.xlane.xlu0 %1974 }
 0xd12   :  { %v1977_v36 = vmul.f32 0.03125, %v1975_v35  ;;  %v1972_v37 = vpop.xlane.xlu1 %1971 }
 0xd13   :  { %v1976_v38 = vmul.f32 0.03125, %v1972_v37 }
 0xd14   :  { %v1979_v40 = vsub.f32 %v1967_v31, %v1977_v36 }
 0xd15   :  { %v1978_v41 = vsub.f32 %v1966_v32, %v1976_v38 }
 0xd16   :  { %v1981_v42 = vmul.f32 %v1979_v40, %v1979_v40 }
 0xd17   :  { %v1980_v44 = vmul.f32 %v1978_v41, %v1978_v41 }
 0xd18   :  { %v1985_v46 = vsel %vm77_vm0, %v1981_v42, 0.0 }
 0xd19   :  { %1986 = vadd.xlane.f32.xlu0 %v1985_v46  ;;  %v1982_v47 = vsel %vm77_vm0, %v1980_v44, 0.0 }
 0xd1a   :  { %1983 = vadd.xlane.f32.xlu1 %v1982_v47 }
 0xda6   :  { %v1987_v53 = vpop.xlane.xlu0 %1986 }
 0xda7   :  { %v1989_v54 = vmul.f32 0.03125, %v1987_v53  ;;  %v1984_v55 = vpop.xlane.xlu1 %1983 }
 0xda8   :  { %v1988_v56 = vmul.f32 0.03125, %v1984_v55 }
 0xda9   :  { %v1991_v57 = vadd.f32 1e-05, %v1989_v54 }
 0xdaa   :  { %v1990_v58 = vadd.f32 1e-05, %v1988_v56 }
 0xdab   :  { %4667 = vrsqrt.f32 %v1991_v57 }
 0xdac   :  { %4669 = vrsqrt.f32 %v1990_v58 }
 0xdb5   :  { %v4668_v59 = vpop.eup %4667 }
 0xdb6   :  { %v4670_v61 = vpop.eup %4669  ;;  %v1995_v62 = vmul.f32 %v4668_v59, %v1979_v40 }
 0xdb7   :  { %v1994_v63 = vmul.f32 %v4670_v61, %v1978_v41 }
 0xdb8   :  { %v2003_v1 = vmul.f32 %v3966_v60, %v1995_v62 }
 0xdb9   :  { %v2002_v2 = vmul.f32 %v3966_v60, %v1994_v63 }
 0xdba   :  { %v2011_v3 = vadd.f32 %v3967_v0, %v2003_v1 }
 0xdbb   :  { %v2010_v4 = vadd.f32 %v3967_v0, %v2002_v2 }
 0xdbc   :  { %v5232_v8 = vadd.f32 %v2011_v3, %v5148_v45 }
 0xdbd   :  { %v5229_v5 = vadd.f32 %v2010_v4, %v5144_v43 }
 0xdbf   :  { %4351 = vmatprep.mubr.msk.f32.mxu1 %vm77_vm0, %v5229_v5 }
 0xdc0   :  { %4352 = vmatmul.mubr.msk.f32.vlgmr.msra.gmra.mrb[24].mxu1 %vm77_vm0, %v5232_v8 }
 0xdc1   :  { %4356 = vmatprep.mubr.msk.f32.mxu1 %vm4787_vm3, %v4786_v9 }
 0xe93   :  { %v4353_v12 = vpop.f32.mrb[24].mxu1 }
 0xe94   :  { %v5243_v13 = vadd.f32 %v4353_v12, %v3973_v11  ;;  %v2099_v43 = vpop.f32.mrb[25].mxu1 }
 0xe95   :  { %v2100_v14 = vadd.f32 %v3973_v11, %v2099_v43 }
 0xe97   :  { %2114 = vrot.lane.b32.xlu0 %v2100_v14, %s4790_s23  ;;  %2110 = vrot.lane.b32.xlu1 %v2100_v14, %s4789_s22 }
 0xe9b   :  { %2118 = vrot.lane.b32.xlu1 %v2100_v14, %s4788_s2 }
 0xe9f   :  { %2122 = vrot.lane.b32.xlu1 %v2100_v14, %s4791_s24 }
 0xf09   :  { %v2115_v45 = vpop.permute.xlu0 %2114  ;;  %v2111_v15 = vpop.permute.xlu1 %2110 }
 0xf0a   :  { %2274 = vrot.lane.b32.xlu1 %v2115_v45, %s4791_s24  ;;  %2198 = vrot.lane.b32.xlu0 %v2111_v15, %s4791_s24 }
 0xf0d   :  { %v2119_v30 = vpop.permute.xlu1 %2118 }
 0xf0e   :  { %2350 = vrot.lane.b32.xlu0 %v2119_v30, %s4791_s24 }
 0xf11   :  { %v2123_v16 = vpop.permute.xlu1 %2122 }
 0xf12   :  { %4355 = vmatpush3.xpose.msk.msra.mxu1 %vm267_vm4, %v2123_v16 }
 0xf13   :  { %4359 = vmatprep.subr.mxu1 %v4786_v9 }
 0xf15   :  { %4357 = vmatmul.mubr.msk.f32.vlgmr.msra.gmra.mrb[26].mxu1 %vm267_vm4, %v2100_v14 }
 0xf16   :  { %4361 = vmatprep.mubr.msk.f32.mxu1 %vm4787_vm3, %v4786_v9 }
 0xf7c   :  { %v2199_v17 = vpop.permute.xlu0 %2198  ;;  %v2275_v18 = vpop.permute.xlu1 %2274 }
 0xf7d   :  { %4360 = vmatpush3.xpose.msk.msra.mxu1 %vm267_vm4, %v2199_v17 }
 0xf7e   :  { %4364 = vmatprep.subr.mxu1 %v4786_v9 }
 0xf80   :  { %4362 = vmatmul.mubr.msk.f32.vlgmr.msra.gmra.mrb[28].mxu1 %vm267_vm4, %v2111_v15  ;;  %v2351_v19 = vpop.permute.xlu0 %2350 }
 0xf81   :  { %4365 = vmatpush3.xpose.msk.msra.mxu1 %vm267_vm4, %v2275_v18  ;;  %4366 = vmatprep.mubr.msk.f32.mxu1 %vm4787_vm3, %v4786_v9 }
 0xf82   :  { %4369 = vmatprep.subr.mxu1 %v4786_v9 }
 0xf84   :  { %4367 = vmatmul.mubr.msk.f32.vlgmr.msra.gmra.mrb[30].mxu1 %vm267_vm4, %v2115_v45 }
 0xf85   :  { %4370 = vmatpush3.xpose.msk.msra.mxu1 %vm267_vm4, %v2351_v19  ;;  %4371 = vmatprep.mubr.msk.f32.mxu1 %vm4787_vm3, %v4786_v9 }
 0xf86   :  { %4374 = vmatprep.subr.mxu1 %v4786_v9 }
 0xf88   :  { %4372 = vmatmul.mubr.msk.f32.vlgmr.msra.gmra.mrb[32].mxu1 %vm267_vm4, %v2119_v30 }
 0xf89   :  { %4376 = vmatprep.mubr.msk.f32.mxu1 %vm4787_vm3, %v4786_v9 }
 0xfe8   :  { %v2194_v20 = vpop.f32.mrb[26].mxu1 }
 0xfe9   :  { %v2426_v27 = vmul.f32 0.35355338, %v2194_v20  ;;  %v4358_v26 = vpop.f32.mrb[27].mxu1 }
 0xfeb   :  { %v2430_v21 = vsel %vm267_vm4, %v2426_v27, -inf }
 0xfec   :  { %2431 = vmax.xlane.f32.xlu1 %v2430_v21 }
0x1053   :  { %v2270_v22 = vpop.f32.mrb[28].mxu1 }
0x1054   :  { %v2427_v23 = vmul.f32 0.35355338, %v2270_v22  ;;  %v4363_v24 = vpop.f32.mrb[29].mxu1 }
0x1056   :  { %v2433_v25 = vsel %vm267_vm4, %v2427_v23, -inf }
0x1057   :  { %2434 = vmax.xlane.f32.xlu0 %v2433_v25  ;;  %v2346_v7 = vpop.f32.mrb[30].mxu1 }
0x1058   :  { %v2428_v10 = vmul.f32 0.35355338, %v2346_v7  ;;  %v4368_v28 = vpop.f32.mrb[31].mxu1 }
0x105a   :  { %v2436_v6 = vsel %vm267_vm4, %v2428_v10, -inf }
0x105b   :  { %2437 = vmax.xlane.f32.xlu0 %v2436_v6  ;;  %v2422_v29 = vpop.f32.mrb[32].mxu1 }
0x105c   :  { %v2429_v31 = vmul.f32 0.35355338, %v2422_v29  ;;  %v4373_v32 = vpop.f32.mrb[33].mxu1 }
0x105e   :  { %v2439_v33 = vsel %vm267_vm4, %v2429_v31, -inf }
0x105f   :  { %2440 = vmax.xlane.f32.xlu1 %v2439_v33 }
0x1070   :  { %2116 = vrot.lane.b32.xlu1 %v5243_v13, %s4790_s23 }
0x1071   :  { %2112 = vrot.lane.b32.xlu0 %v5243_v13, %s4789_s22 }
0x1074   :  { %2120 = vrot.lane.b32.xlu1 %v5243_v13, %s4788_s2  ;;  %s5586_s2 = smov 24  }
0x1075   :  { %2554 = vrot.lane.b32.xlu0 %v2111_v15, %s4792_s25 }
0x1078   :  { %2478 = vrot.lane.b32.xlu1 %v2100_v14, %s4792_s25 }
0x1079   :  { %v2432_v34 = vpop.xlane.xlu1 %2431 }
0x107a   :  { %v2442_v35 = vsub.f32 %v2426_v27, %v2432_v34 }
0x107c   :  { %2630 = vrot.lane.b32.xlu1 %v2115_v45, %s4792_s25  ;;  %v2446_v36 = vmul.f32 1.442695, %v2442_v35 }
0x107e   :  { %4671 = vpow2.f32 %v2446_v36 }
0x1080   :  { %2706 = vrot.lane.b32.xlu1 %v2119_v30, %s4792_s25 }
0x1088   :  { %v4672_v37 = vpop.eup %4671 }
0x1089   :  { %v2454_v38 = vsel %vm267_vm4, %v4672_v37, 0.0 }
0x1094   :  { %2455 = vadd.xlane.f32.xlu0 %v2454_v38 }
0x10aa   :  { %2782 = vrot.lane.b32.xlu0 %v5243_v13, %s4791_s24 }
0x10e4   :  { %v2435_v40 = vpop.xlane.xlu0 %2434 }
0x10e5   :  { %v2443_v41 = vsub.f32 %v2427_v23, %v2435_v40 }
0x10e7   :  { %v2448_v42 = vmul.f32 1.442695, %v2443_v41 }
0x10e8   :  { %v2438_v44 = vpop.xlane.xlu0 %2437 }
0x10e9   :  { %4673 = vpow2.f32 %v2448_v42  ;;  %v2444_v46 = vsub.f32 %v2428_v10, %v2438_v44 }
0x10eb   :  { %v2450_v47 = vmul.f32 1.442695, %v2444_v46 }
0x10ec   :  { %v2441_v39 = vpop.xlane.xlu1 %2440  ;;  %v5298_v60 = vpop.permute.xlu0 %2112 }
0x10ed   :  { %4675 = vpow2.f32 %v2450_v47  ;;  %v2445_v48 = vsub.f32 %v2429_v31, %v2441_v39 }
0x10ef   :  { %v2452_v49 = vmul.f32 1.442695, %v2445_v48 }
0x10f0   :  { %v5289_v50 = vpop.permute.xlu1 %2116  ;;  %v2555_v61 = vpop.permute.xlu0 %2554 }
0x10f1   :  { %4677 = vpow2.f32 %v2452_v49 }
0x10f3   :  { %v4674_v51 = vpop.eup %4673 }
0x10f4   :  { %v5291_v52 = vpop.permute.xlu1 %2120  ;;  %v2457_v53 = vsel %vm267_vm4, %v4674_v51, 0.0 }
0x10f5   :  { %2458 = vadd.xlane.f32.xlu1 %v2457_v53 }
0x10f7   :  { %v4676_v54 = vpop.eup %4675 }
0x10f8   :  { %v2479_v55 = vpop.permute.xlu1 %2478  ;;  %v2460_v56 = vsel %vm267_vm4, %v4676_v54, 0.0 }
0x10f9   :  { %2461 = vadd.xlane.f32.xlu0 %v2460_v56  ;;  %4375 = vmatpush3.msra.mxu1 %v2479_v55 }
0x10fa   :  { %4379 = vmatprep.subr.mxu1 %v4786_v9 }
0x10fb   :  { %v4678_v57 = vpop.eup %4677 }
0x10fc   :  { %v2631_v58 = vpop.permute.xlu1 %2630  ;;  %v2463_v59 = vsel %vm267_vm4, %v4678_v57, 0.0 }
0x10fd   :  { %2464 = vadd.xlane.f32.xlu0 %v2463_v59  ;;  %4385 = vmatpush3.msra.mxu0 %v2631_v58 }
0x10fe   :  { %4394 = vmatprep.subr.mxu0 %v4786_v9 }
0x1100   :  { %v2707_v1 = vpop.permute.xlu1 %2706 }
0x1106   :  { %2858 = vrot.lane.b32.xlu1 %v5298_v60, %s4791_s24 }
0x110a   :  { %3010 = vrot.lane.b32.xlu1 %v5291_v52, %s4791_s24 }
0x1113   :  { %2934 = vrot.lane.b32.xlu0 %v5289_v50, %s4791_s24 }
0x1121   :  { %v2456_v62 = vpop.xlane.xlu0 %2455 }
0x1122   :  { %4679 = vrcp.f32 %v2456_v62 }
0x1125   :  { %v2783_v2 = vpop.permute.xlu0 %2782 }
0x112c   :  { %v4680_v63 = vpop.eup %4679 }
0x112d   :  { %v2467_v0 = vmul.f32 %v4680_v63, %v4672_v37 }
0x112f   :  { %2474 = vst.msk [vmem:[#allocation6] sm:$0xff] %vm267_vm4, %v2467_v0  ;;  %4377 = vmatmul.mubr.msk.f32.vlgmr.msra.gmra.mrb[34].mxu1 %vm267_vm4, %v2467_v0 }
0x1130   :  { %4380 = vmatpush3.msra.mxu1 %v2555_v61  ;;  %4381 = vmatprep.mubr.msk.f32.mxu1 %vm4787_vm3, %v4786_v9 }
0x1131   :  { %4389 = vmatprep.subr.mxu1 %v4786_v9 }
0x1182   :  { %v2459_v3 = vpop.xlane.xlu1 %2458 }
0x1183   :  { %4681 = vrcp.f32 %v2459_v3 }
0x1186   :  { %v2462_v4 = vpop.xlane.xlu0 %2461  ;;  %v2859_v30 = vpop.permute.xlu1 %2858 }
0x1187   :  { %4683 = vrcp.f32 %v2462_v4 }
0x118a   :  { %v2465_v11 = vpop.xlane.xlu0 %2464  ;;  %v3011_v18 = vpop.permute.xlu1 %3010 }
0x118b   :  { %4685 = vrcp.f32 %v2465_v11 }
0x118d   :  { %v4682_v12 = vpop.eup %4681 }
0x118e   :  { %v2469_v43 = vmul.f32 %v4682_v12, %v4674_v51  ;;  %v2935_v17 = vpop.permute.xlu0 %2934 }
0x1190   :  { %2475 = vst.msk [vmem:[#allocation6 + $0x8] sm:$0xff] %vm267_vm4, %v2469_v43  ;;  %4382 = vmatmul.mubr.msk.f32.vlgmr.msra.gmra.mrb[36].mxu1 %vm267_vm4, %v2469_v43 }
0x1191   :  { %v4684_v14 = vpop.eup %4683  ;;  %4390 = vmatpush3.msra.mxu1 %v2707_v1  ;;  %4391 = vmatprep.mubr.msk.f32.mxu1 %vm4787_vm3, %v4786_v9 }
0x1192   :  { %v2471_v45 = vmul.f32 %v4684_v14, %v4676_v54  ;;  %4399 = vmatprep.subr.mxu1 %v4786_v9 }
0x1194   :  { %2476 = vst.msk [vmem:[#allocation6 + $0x10] sm:$0xff] %vm267_vm4, %v2471_v45  ;;  %4387 = vmatmul.mubr.msk.f32.vlgmr.msra.gmra.mrb[18].mxu0 %vm267_vm4, %v2471_v45 }
0x1195   :  { %v4686_v15 = vpop.eup %4685  ;;  %4395 = vmatpush3.xpose.msk.msra.mxu0 %vm267_vm4, %v2783_v2  ;;  %4396 = vmatprep.mubr.msk.f32.mxu0 %vm4787_vm3, %v4786_v9 }
0x1196   :  { %v2473_v16 = vmul.f32 %v4686_v15, %v4678_v57  ;;  %4404 = vmatprep.subr.mxu0 %v4786_v9 }
0x1198   :  { %2477 = vst.msk [vmem:[#allocation6 + $0x18] sm:$0xff] %vm267_vm4, %v2473_v16  ;;  %4392 = vmatmul.mubr.msk.f32.vlgmr.msra.gmra.mrb[38].mxu1 %vm267_vm4, %v2473_v16  ;;  %4397 = vmatmul.mubr.msk.f32.vlgmr.msra.gmra.mrb[20].mxu0 %vm267_vm4, %v5243_v13 }
0x1199   :  { %4400 = vmatpush3.xpose.msk.msra.mxu1 %vm267_vm4, %v2859_v30  ;;  %4405 = vmatpush3.xpose.msk.msra.mxu0 %vm267_vm4, %v2935_v17 }
0x119a   :  { %4401 = vmatprep.mubr.msk.f32.mxu1 %vm4787_vm3, %v4786_v9  ;;  %4406 = vmatprep.mubr.msk.f32.mxu0 %vm4787_vm3, %v4786_v9 }
0x119b   :  { %4409 = vmatprep.subr.mxu1 %v4786_v9  ;;  %4414 = vmatprep.subr.mxu0 %v4786_v9 }
0x119c   :  { %4402 = vmatmul.mubr.msk.f32.vlgmr.msra.gmra.mrb[40].mxu1 %vm267_vm4, %v5298_v60  ;;  %4407 = vmatmul.mubr.msk.f32.vlgmr.msra.gmra.mrb[22].mxu0 %vm267_vm4, %v5289_v50 }
0x119d   :  { %4410 = vmatpush3.xpose.msk.msra.mxu1 %vm267_vm4, %v3011_v18  ;;  %4411 = vmatprep.mubr.msk.f32.mxu1 %vm4787_vm3, %v4786_v9 }
0x119e   :  { %4419 = vmatprep.subr.mxu1 %v4786_v9  ;;  %4416 = vmatprep.mubr.msk.f32.mxu0 %vm4787_vm3, %v4786_v9 }
0x11a0   :  { %4412 = vmatmul.mubr.msk.f32.vlgmr.msra.gmra.mrb[42].mxu1 %vm267_vm4, %v5291_v52 }
0x11a1   :  { %4421 = vmatprep.mubr.msk.f32.mxu1 %vm4787_vm3, %v4786_v9 }
0x1202   :  { %v5348_v19 = vpop.f32.mrb[34].mxu1 }
0x1203   :  { %v4378_v20 = vpop.f32.mrb[35].mxu1 }
0x1263   :  { %v2626_v27 = vpop.f32.mrb[36].mxu1 }
0x1264   :  { %v4383_v26 = vpop.f32.mrb[37].mxu1 }
0x1267   :  { %v2702_v21 = vpop.f32.mrb[18].mxu0 }
0x1268   :  { %v4388_v22 = vpop.f32.mrb[19].mxu0 }
0x126b   :  { %v2778_v23 = vpop.f32.mrb[38].mxu1  ;;  %v2854_v24 = vpop.f32.mrb[20].mxu0 }
0x126c   :  { %v3086_v25 = vmul.f32 0.35355338, %v2854_v24  ;;  %v4393_v7 = vpop.f32.mrb[39].mxu1  ;;  %v4398_v10 = vpop.f32.mrb[21].mxu0 }
0x126e   :  { %v3090_v28 = vsel %vm267_vm4, %v3086_v25, -inf }
0x126f   :  { %3091 = vmax.xlane.f32.xlu0 %v3090_v28  ;;  %v2930_v6 = vpop.f32.mrb[40].mxu1  ;;  %v3006_v29 = vpop.f32.mrb[22].mxu0 }
0x1270   :  { %v3087_v31 = vmul.f32 0.35355338, %v2930_v6  ;;  %v3088_v32 = vmul.f32 0.35355338, %v3006_v29  ;;  %v4403_v33 = vpop.f32.mrb[41].mxu1  ;;  %v4408_v34 = vpop.f32.mrb[23].mxu0 }
0x1272   :  { %v3096_v35 = vsel %vm267_vm4, %v3088_v32, -inf  ;;  %v3093_v36 = vsel %vm267_vm4, %v3087_v31, -inf }
0x1273   :  { %3097 = vmax.xlane.f32.xlu0 %v3096_v35  ;;  %3094 = vmax.xlane.f32.xlu1 %v3093_v36  ;;  %v3082_v37 = vpop.f32.mrb[42].mxu1 }
0x1274   :  { %v3089_v38 = vmul.f32 0.35355338, %v3082_v37  ;;  %v4413_v40 = vpop.f32.mrb[43].mxu1 }
0x1276   :  { %v3099_v41 = vsel %vm267_vm4, %v3089_v38, -inf }
0x1277   :  { %3100 = vmax.xlane.f32.xlu0 %v3099_v41 }
0x1284   :  { %3139 = vrot.lane.b32.xlu1 %v5243_v13, %s4792_s25 }
0x12fc   :  { %v3092_v42 = vpop.xlane.xlu0 %3091 }
0x12fd   :  { %v3102_v44 = vsub.f32 %v3086_v25, %v3092_v42  ;;  %v4003_v25 = vld [vmem:[%s5562_s5 + $0x38] sm:$0xff]  ;;  %v4005_v42 = vld [vmem:[%s5563_s6 + $0x1] ss:$0 sm:$0xff] }
0x12ff   :  { %v3106_v46 = vmul.f32 1.442695, %v3102_v44 }
0x1300   :  { %v3098_v47 = vpop.xlane.xlu0 %3097  ;;  %v3095_v39 = vpop.xlane.xlu1 %3094 }
0x1301   :  { %4687 = vpow2.f32 %v3106_v46  ;;  %v3104_v48 = vsub.f32 %v3088_v32, %v3098_v47  ;;  %v3103_v49 = vsub.f32 %v3087_v31, %v3095_v39 }
0x1303   :  { %v3110_v51 = vmul.f32 1.442695, %v3104_v48  ;;  %v3108_v53 = vmul.f32 1.442695, %v3103_v49 }
0x1304   :  { %v3101_v54 = vpop.xlane.xlu0 %3100  ;;  %v3140_v55 = vpop.permute.xlu1 %3139 }
0x1305   :  { %4689 = vpow2.f32 %v3110_v51  ;;  %v3105_v56 = vsub.f32 %v3089_v38, %v3101_v54  ;;  %4415 = vmatpush3.msra.mxu0 %v3140_v55 }
0x1306   :  { %4691 = vpow2.f32 %v3108_v53  ;;  %4424 = vmatprep.subr.mxu0 %v4786_v9 }
0x1307   :  { %v3112_v57 = vmul.f32 1.442695, %v3105_v56 }
0x1309   :  { %4693 = vpow2.f32 %v3112_v57 }
0x130b   :  { %v4688_v13 = vpop.eup %4687 }
0x130c   :  { %v3114_v58 = vsel %vm267_vm4, %v4688_v13, 0.0 }
0x130d   :  { %3115 = vadd.xlane.f32.xlu1 %v3114_v58 }
0x130f   :  { %v4690_v59 = vpop.eup %4689 }
0x1310   :  { %v4692_v61 = vpop.eup %4691  ;;  %v3120_v62 = vsel %vm267_vm4, %v4690_v59, 0.0 }
0x1311   :  { %3121 = vadd.xlane.f32.xlu1 %v3120_v62  ;;  %v3117_v63 = vsel %vm267_vm4, %v4692_v61, 0.0 }
0x1312   :  { %3118 = vadd.xlane.f32.xlu0 %v3117_v63  ;;  %v4013_v63 = vld [vmem:[%s5566_s9 + $0x28] sm:$0xff] }
0x1313   :  { %v4694_v0 = vpop.eup %4693 }
0x1314   :  { %v3123_v1 = vsel %vm267_vm4, %v4694_v0, 0.0 }
0x1316   :  { %3124 = vadd.xlane.f32.xlu0 %v3123_v1  ;;  %v4014_v1 = vld [vmem:[%s5566_s9 + $0x30] sm:$0xff] }
0x1322   :  { %3291 = vrot.lane.b32.xlu1 %v5289_v50, %s4792_s25 }
0x1326   :  { %3367 = vrot.lane.b32.xlu1 %v5291_v52, %s4792_s25 }
0x132c   :  { %3215 = vrot.lane.b32.xlu0 %v5298_v60, %s4792_s25 }
0x1330   :  { %3445 = vrot.lane.b32.xlu0 %v2626_v27, %s4793_s27 }
0x1334   :  { %3453 = vrot.lane.b32.xlu0 %v2702_v21, %s5585_s4 }
0x1338   :  { %3461 = vrot.lane.b32.xlu0 %v2778_v23, %s5586_s2  ;;  %v4001_v23 = vld [vmem:[%s5562_s5 + $0x28] sm:$0xff] }
0x139a   :  { %v3116_v2 = vpop.xlane.xlu1 %3115 }
0x139b   :  { %4695 = vrcp.f32 %v3116_v2  ;;  %v4015_v2 = vld [vmem:[%s5566_s9 + $0x38] sm:$0xff] }
0x139e   :  { %v3122_v3 = vpop.xlane.xlu1 %3121 }
0x139f   :  { %v3119_v4 = vpop.xlane.xlu0 %3118  ;;  %4697 = vrcp.f32 %v3122_v3  ;;  %v4575_v3 = vpack.c.bf16 %v4015_v2, %v4014_v1 }
0x13a0   :  { %4699 = vrcp.f32 %v3119_v4  ;;  %v4020_v4 = vld [vmem:[%s5568_s11 + $0x80] sm:$0xff] }
0x13a2   :  { %v3292_v52 = vpop.permute.xlu1 %3291 }
0x13a3   :  { %v3125_v11 = vpop.xlane.xlu0 %3124 }
0x13a4   :  { %4701 = vrcp.f32 %v3125_v11  ;;  %v4021_v11 = vld [vmem:[%s5568_s11 + $0x88] sm:$0xff] }
0x13a5   :  { %v4696_v50 = vpop.eup %4695 }
0x13a6   :  { %v3127_v12 = vmul.f32 %v4696_v50, %v4688_v13  ;;  %v3368_v16 = vpop.permute.xlu1 %3367  ;;  %v4579_v50 = vpack.c.bf16 %v4021_v11, %v4020_v4 }
0x13a7   :  { %v3216_v43 = vpop.permute.xlu0 %3215 }
0x13a8   :  { %3135 = vst.msk [vmem:[#allocation6 + $0x20] sm:$0xff] %vm267_vm4, %v3127_v12  ;;  %4420 = vmatpush3.msra.mxu1 %v3216_v43  ;;  %4417 = vmatmul.mubr.msk.f32.vlgmr.msra.gmra.mrb[24].mxu0 %vm267_vm4, %v3127_v12 }
0x13a9   :  { %v4698_v60 = vpop.eup %4697  ;;  %4425 = vmatpush3.msra.mxu0 %v3292_v52  ;;  %4426 = vmatprep.mubr.msk.f32.mxu0 %vm4787_vm3, %v4786_v9 }
0x13aa   :  { %v4700_v14 = vpop.eup %4699  ;;  %v3131_v45 = vmul.f32 %v4698_v60, %v4690_v59  ;;  %4429 = vmatprep.subr.mxu1 %v4786_v9 }
0x13ab   :  { %v3129_v15 = vmul.f32 %v4700_v14, %v4692_v61  ;;  %v3446_v30 = vpop.permute.xlu0 %3445 }
0x13ac   :  { %3137 = vst.msk [vmem:[#allocation6 + $0x30] sm:$0xff] %vm267_vm4, %v3131_v45  ;;  %4427 = vmatmul.mubr.msk.f32.vlgmr.msra.gmra.mrb[26].mxu0 %vm267_vm4, %v3131_v45  ;;  %v3467_v27 = vsel %vm267_vm4, %v5348_v19, %v3446_v30  ;;  %v4002_v19 = vld [vmem:[%s5562_s5 + $0x30] sm:$0xff]  ;;  %v4010_v30 = vld [vmem:[%s5564_s7 + $0x1] ss:$0 sm:$0xff] }
0x13ad   :  { %3136 = vst.msk [vmem:[#allocation6 + $0x28] sm:$0xff] %vm267_vm4, %v3129_v15  ;;  %4422 = vmatmul.mubr.msk.f32.vlgmr.msra.gmra.mrb[44].mxu1 %vm267_vm4, %v3129_v15  ;;  %v4567_v7 = vpack.c.bf16 %v4003_v25, %v4002_v19  ;;  %v4024_v19 = vld [vmem:[%s5568_s11 + $0xa0] sm:$0xff]  ;;  %v4025_v25 = vld [vmem:[%s5568_s11 + $0xa8] sm:$0xff] }
0x13ae   :  { %v4702_v17 = vpop.eup %4701  ;;  %4430 = vmatpush3.msra.mxu1 %v3368_v16  ;;  %4431 = vmatprep.mubr.msk.f32.mxu1 %vm4787_vm3, %v4786_v9  ;;  %v4000_v9 = vld [vmem:[%s5562_s5 + $0x20] sm:$0xff] }
0x13af   :  { %v3133_v18 = vmul.f32 %v4702_v17, %v4694_v0  ;;  %v3454_v20 = vpop.permute.xlu0 %3453  ;;  %v4563_v24 = vpack.c.bf16 %v4001_v23, %v4000_v9  ;;  %v4011_v17 = vld [vmem:[%s5565_s8 + $0x1] ss:$0 sm:$0xff]  ;;  %v4022_v9 = vld [vmem:[%s5568_s11 + $0x90] sm:$0xff]  ;;  %v4023_v23 = vld [vmem:[%s5568_s11 + $0x98] sm:$0xff] }
0x13b0   :  { %v3469_v26 = vsel %vm1613_vm5, %v3467_v27, %v3454_v20 }
0x13b1   :  { %3138 = vst.msk [vmem:[#allocation6 + $0x38] sm:$0xff] %vm267_vm4, %v3133_v18  ;;  %4432 = vmatmul.mubr.msk.f32.vlgmr.msra.gmra.mrb[46].mxu1 %vm267_vm4, %v3133_v18  ;;  %4564 = vmatprep.subr.bf16.mxu0 %v4563_v24 }
0x13b2   :  { %4566 = vmatpush3.bf16.msra.mxu0 %v4563_v24  ;;  %v4583_v24 = vpack.c.bf16 %v4023_v23, %v4022_v9 }
0x13b3   :  { %v3462_v21 = vpop.permute.xlu0 %3461  ;;  %4568 = vmatprep.subr.bf16.mxu0 %v4567_v7 }
0x13b4   :  { %v3471_v22 = vsel %vm1616_vm6, %v3469_v26, %v3462_v21 }
0x13b5   :  { %4442 = vmatprep.mubr.msk.f32.mxu0 %vm77_vm0, %v3471_v22 }
0x13b6   :  { %4570 = vmatpush3.bf16.msra.mxu0 %v4567_v7  ;;  %v4587_v7 = vpack.c.bf16 %v4025_v25, %v4024_v19 }
0x13b7   :  { %4580 = vmatprep.subr.bf16.mxu0 %v4579_v50 }
0x147b   :  { %v3211_v10 = vpop.f32.mrb[24].mxu0 }
0x147c   :  { %v4418_v28 = vpop.f32.mrb[25].mxu0 }
0x147d   :  { %v4027_v28 = vld [vmem:[%s5568_s11 + $0xb8] sm:$0xff] }
0x147f   :  { %v3363_v6 = vpop.f32.mrb[26].mxu0 }
0x1480   :  { %v3287_v29 = vpop.f32.mrb[44].mxu1  ;;  %v4428_v31 = vpop.f32.mrb[27].mxu0 }
0x1481   :  { %3447 = vrot.lane.b32.xlu1 %v3287_v29, %s4793_s27  ;;  %v4423_v32 = vpop.f32.mrb[45].mxu1  ;;  %v4028_v29 = vld [vmem:[%s5568_s11 + $0xc0] sm:$0xff]  ;;  %v4029_v31 = vld [vmem:[%s5568_s11 + $0xc8] sm:$0xff] }
0x1482   :  { %v4595_v32 = vpack.c.bf16 %v4029_v31, %v4028_v29 }
0x1484   :  { %v3439_v33 = vpop.f32.mrb[46].mxu1 }
0x1485   :  { %3455 = vrot.lane.b32.xlu1 %v3363_v6, %s5585_s4  ;;  %v4433_v34 = vpop.f32.mrb[47].mxu1 }
0x1486   :  { %v4031_v34 = vld [vmem:[%s5568_s11 + $0xd8] sm:$0xff] }
0x1489   :  { %3463 = vrot.lane.b32.xlu1 %v3439_v33, %s5586_s2  ;;  %v4030_v33 = vld [vmem:[%s5568_s11 + $0xd0] sm:$0xff] }
0x14f3   :  { %v3448_v35 = vpop.permute.xlu1 %3447 }
0x14f4   :  { %v3468_v37 = vsel %vm267_vm4, %v3211_v10, %v3448_v35  ;;  %v4026_v10 = vld [vmem:[%s5568_s11 + $0xb0] sm:$0xff]  ;;  %v4599_v35 = vpack.c.bf16 %v4031_v34, %v4030_v33 }
0x14f5   :  { %v4591_v6 = vpack.c.bf16 %v4027_v28, %v4026_v10 }
0x14f7   :  { %v3456_v36 = vpop.permute.xlu1 %3455 }
0x14f8   :  { %v3470_v38 = vsel %vm1613_vm5, %v3468_v37, %v3456_v36  ;;  %v4032_v36 = vld [vmem:[%s5568_s11 + $0xe0] sm:$0xff]  ;;  %v4033_v37 = vld [vmem:[%s5568_s11 + $0xe8] sm:$0xff] }
0x14fb   :  { %v3464_v40 = vpop.permute.xlu1 %3463 }
0x14fc   :  { %v3472_v41 = vsel %vm1616_vm6, %v3470_v38, %v3464_v40  ;;  %v4603_v38 = vpack.c.bf16 %v4033_v37, %v4032_v36  ;;  %v4034_v40 = vld [vmem:[%s5568_s11 + $0xf0] sm:$0xff] }
0x14fd   :  { %4443 = vmatmul.mubr.msk.f32.vlgmr.msra.gmra.mrb[28].mxu0 %vm77_vm0, %v3472_v41  ;;  %v4035_v41 = vld [vmem:[%s5568_s11 + $0xf8] sm:$0xff] }
0x14fe   :  { %4582 = vmatpush3.bf16.msra.mxu0 %v4579_v50 }
0x14ff   :  { %4584 = vmatprep.subr.bf16.mxu0 %v4583_v24 }
0x1502   :  { %4586 = vmatpush3.bf16.msra.mxu0 %v4583_v24 }
0x1503   :  { %4588 = vmatprep.subr.bf16.mxu0 %v4587_v7 }
0x1506   :  { %4590 = vmatpush3.bf16.msra.mxu0 %v4587_v7 }
0x1507   :  { %4592 = vmatprep.subr.bf16.mxu0 %v4591_v6 }
0x150a   :  { %4594 = vmatpush3.bf16.msra.mxu0 %v4591_v6 }
0x150b   :  { %4596 = vmatprep.subr.bf16.mxu0 %v4595_v32 }
0x150e   :  { %4598 = vmatpush3.bf16.msra.mxu0 %v4595_v32 }
0x150f   :  { %4600 = vmatprep.subr.bf16.mxu0 %v4599_v35 }
0x1512   :  { %4602 = vmatpush3.bf16.msra.mxu0 %v4599_v35 }
0x1513   :  { %4604 = vmatprep.subr.bf16.mxu0 %v4603_v38 }
0x1516   :  { %4606 = vmatpush3.bf16.msra.mxu0 %v4603_v38 }
0x15d0   :  { %v4444_v44 = vpop.f32.mrb[28].mxu0 }
0x15d1   :  { %v3564_v46 = vadd.f32 %v4444_v44, %v4005_v42  ;;  %v3558_v47 = vpop.f32.mrb[29].mxu0  ;;  %v4017_v44 = vld [vmem:[%s5567_s10 + $0x1] ss:$0 sm:$0xff] }
0x15d2   :  { %v3559_v39 = vadd.f32 %v4005_v42, %v3558_v47  ;;  %v4607_v42 = vpack.c.bf16 %v4035_v41, %v4034_v40 }
0x15d3   :  { %v3568_v48 = vadd.f32 %v3564_v46, %v5232_v8 }
0x15d4   :  { %v3567_v49 = vadd.f32 %v3559_v39, %v5229_v5  ;;  %v4012_v5 = vld [vmem:[%s5566_s9 + $0x20] sm:$0xff]  ;;  %4608 = vmatprep.subr.bf16.mxu0 %v4607_v42 }
0x15d5   :  { %v3576_v51 = vsel %vm77_vm0, %v3568_v48, 0.0  ;;  %v4571_v0 = vpack.c.bf16 %v4013_v63, %v4012_v5  ;;  %4610 = vmatpush3.bf16.msra.mxu0 %v4607_v42 }
0x15d6   :  { %3577 = vadd.xlane.f32.xlu1 %v3576_v51  ;;  %v3573_v53 = vsel %vm77_vm0, %v3567_v49, 0.0 }
0x15d7   :  { %3574 = vadd.xlane.f32.xlu0 %v3573_v53  ;;  %4572 = vmatprep.subr.bf16.mxu1 %v4571_v0 }
0x15d8   :  { %4574 = vmatpush3.bf16.msra.mxu1 %v4571_v0 }
0x15d9   :  { %4576 = vmatprep.subr.bf16.mxu1 %v4575_v3 }
0x15dc   :  { %4578 = vmatpush3.bf16.msra.mxu1 %v4575_v3  ;;  %v4037_v3 = vld [vmem:[%s5569_s12 + $0x1] ss:$0 sm:$0xff]  ;;  %s4796_s12 = smov [#allocation4]  }
0x15dd   :  { %s3896_s28 = sshll.u32 %s4796_s12, 4  ;;  %s3897_s28 = int_to_ptr.vmem [resolvable:$true] %s3896_s28 }
0x15de   :  { %s4715_s3 = scalar_lea.vmem %s3897_s28, 1024  ;;  %p4720_p1 = scmp.lt.s32.totalorder %s3897_s28, %s3897_s28 }
0x15df   :  { %p4716_p0 = scmp.ne.s32.totalorder %s3897_s28, %s4715_s3  ;;  %p4721_p2 = scmp.lt.s32.totalorder %s4715_s3, %s4715_s3 }
0x15e1   :  { %p4722_p3 = por %p4721_p2, %p4720_p1 }
0x15e3   :  { %p4723_p4 = pnand %p4722_p3, %p4716_p0 }
0x1663   :  { %v3578_v54 = vpop.xlane.xlu1 %3577 }
0x1664   :  { %v3580_v55 = vmul.f32 0.03125, %v3578_v54  ;;  %v3575_v56 = vpop.xlane.xlu0 %3574 }
0x1665   :  { %v3579_v57 = vmul.f32 0.03125, %v3575_v56 }
0x1666   :  { %v3582_v13 = vsub.f32 %v3568_v48, %v3580_v55 }
0x1667   :  { %v3581_v58 = vsub.f32 %v3567_v49, %v3579_v57 }
0x1668   :  { %v3584_v62 = vmul.f32 %v3582_v13, %v3582_v13 }
0x1669   :  { %v3583_v59 = vmul.f32 %v3581_v58, %v3581_v58 }
0x166a   :  { %v3588_v8 = vsel %vm77_vm0, %v3584_v62, 0.0 }
0x166b   :  { %v3585_v61 = vsel %vm77_vm0, %v3583_v59, 0.0 }
0x166c   :  { %3586 = vadd.xlane.f32.xlu0 %v3585_v61 }
0x1670   :  { %3589 = vadd.xlane.f32.xlu0 %v3588_v8 }
0x16f9   :  { %v3587_v12 = vpop.xlane.xlu0 %3586 }
0x16fa   :  { %v3591_v52 = vmul.f32 0.03125, %v3587_v12 }
0x16fc   :  { %v3593_v43 = vadd.f32 1e-05, %v3591_v52 }
0x16fd   :  { %v3590_v60 = vpop.xlane.xlu0 %3589 }
0x16fe   :  { %4703 = vrsqrt.f32 %v3593_v43  ;;  %v3592_v14 = vmul.f32 0.03125, %v3590_v60 }
0x1700   :  { %v3594_v45 = vadd.f32 1e-05, %v3592_v14 }
0x1702   :  { %4705 = vrsqrt.f32 %v3594_v45 }
0x1708   :  { %v4704_v15 = vpop.eup %4703 }
0x1709   :  { %v3597_v16 = vmul.f32 %v4704_v15, %v3581_v58 }
0x170b   :  { %v3605_v18 = vmul.f32 %v4010_v30, %v3597_v16 }
0x170c   :  { %v4706_v20 = vpop.eup %4705 }
0x170d   :  { %v3598_v27 = vmul.f32 %v4706_v20, %v3582_v13  ;;  %v5440_v26 = vadd.f32 %v4011_v17, %v3605_v18 }
0x170f   :  { %v3606_v21 = vmul.f32 %v4010_v30, %v3598_v27  ;;  %4453 = vmatprep.mubr.msk.f32.mxu1 %vm77_vm0, %v5440_v26 }
0x1711   :  { %v5444_v22 = vadd.f32 %v4011_v17, %v3606_v21 }
0x1713   :  { %4454 = vmatmul.mubr.msk.f32.vlgmr.msra.gmra.mrb[48].mxu1 %vm77_vm0, %v5444_v22 }
0x17e6   :  { %v4455_v46 = vpop.f32.mrb[48].mxu1 }
0x17e7   :  { %v3706_v47 = vadd.f32 %v4455_v46, %v4017_v44  ;;  %v3700_v39 = vpop.f32.mrb[49].mxu1 }
0x17e8   :  { %v3701_v48 = vadd.f32 %v4017_v44, %v3700_v39 }
0x17e9   :  { %v3712_v49 = vmul.f32 0.044715, %v3706_v47  ;;  %v3710_v0 = vmul.f32 0.5, %v3706_v47 }
0x17ea   :  { %v3711_v51 = vmul.f32 0.044715, %v3701_v48  ;;  %v3709_v5 = vmul.f32 0.5, %v3701_v48 }
0x17eb   :  { %v3714_v53 = vmul.f32 %v3712_v49, %v3706_v47 }
0x17ec   :  { %v3713_v54 = vmul.f32 %v3711_v51, %v3701_v48 }
0x17ed   :  { %v3716_v55 = vmul.f32 %v3714_v53, %v3706_v47 }
0x17ee   :  { %v3715_v56 = vmul.f32 %v3713_v54, %v3701_v48 }
0x17ef   :  { %v3718_v57 = vadd.f32 %v3716_v55, %v3706_v47 }
0x17f0   :  { %v3717_v13 = vadd.f32 %v3715_v56, %v3701_v48 }
0x17f1   :  { %v3720_v58 = vmul.f32 0.7978846, %v3718_v57 }
0x17f2   :  { %v3719_v59 = vmul.f32 0.7978846, %v3717_v13 }
0x17f3   :  { %4707 = vtanh.f32 %v3720_v58 }
0x17f4   :  { %4709 = vtanh.f32 %v3719_v59 }
0x17fd   :  { %v4708_v61 = vpop.eup %4707 }
0x17fe   :  { %v4710_v62 = vpop.eup %4709  ;;  %v3724_v8 = vadd.f32 1.0, %v4708_v61 }
0x17ff   :  { %v3723_v63 = vadd.f32 1.0, %v4710_v62 }
0x1800   :  { %v3726_v2 = vmul.f32 %v3724_v8, %v3710_v0 }
0x1801   :  { %v3725_v1 = vmul.f32 %v3723_v63, %v3709_v5 }
0x1803   :  { %4488 = vmatprep.mubr.f32.mxu0 %v3725_v1 }
0x1804   :  { %4489 = vmatmul.mubr.f32.vlgmr.msra.gmra.mrb[30].mxu0 %v3726_v2 }
0x18d7   :  { %v4490_v4 = vpop.f32.mrb[30].mxu0 }
0x18d8   :  { %v3824_v11 = vadd.f32 %v4490_v4, %v4037_v3  ;;  %v3818_v50 = vpop.f32.mrb[31].mxu0 }
0x18d9   :  { %v3819_v12 = vadd.f32 %v4037_v3, %v3818_v50 }
0x18da   :  { %v3828_v52 = vadd.f32 %v3824_v11, %v5444_v22 }
0x18db   :  { %v3827_v43 = vadd.f32 %v3819_v12, %v5440_v26 }
0x18dc   :  { %v3836_v60 = vsel %vm77_vm0, %v3828_v52, 0.0 }
0x18dd   :  { %3837 = vadd.xlane.f32.xlu0 %v3836_v60  ;;  %v3833_v14 = vsel %vm77_vm0, %v3827_v43, 0.0 }
0x18de   :  { %3834 = vadd.xlane.f32.xlu1 %v3833_v14 }
0x196a   :  { %v3838_v45 = vpop.xlane.xlu0 %3837 }
0x196b   :  { %v3840_v15 = vmul.f32 0.03125, %v3838_v45  ;;  %v3835_v30 = vpop.xlane.xlu1 %3834 }
0x196c   :  { %v3839_v16 = vmul.f32 0.03125, %v3835_v30 }
0x196d   :  { %v3842_v17 = vsub.f32 %v3828_v52, %v3840_v15 }
0x196e   :  { %v3841_v18 = vsub.f32 %v3827_v43, %v3839_v16 }
0x196f   :  { %v3844_v20 = vmul.f32 %v3842_v17, %v3842_v17 }
0x1970   :  { %v3843_v27 = vmul.f32 %v3841_v18, %v3841_v18 }
0x1971   :  { %v3848_v21 = vsel %vm77_vm0, %v3844_v20, 0.0 }
0x1972   :  { %3849 = vadd.xlane.f32.xlu0 %v3848_v21  ;;  %v3845_v9 = vsel %vm77_vm0, %v3843_v27, 0.0 }
0x1973   :  { %3846 = vadd.xlane.f32.xlu1 %v3845_v9 }
0x1974   :  { %4726 = shalt.err (!%p4723_p4)
}
0x1975   :  { %s4727_s20 = scalar_lea.hbm %s5573_s16, 1024 }
0x1976   :  { %p4728_p5 = scmp.ne.s32.totalorder %s5573_s16, %s4727_s20  ;;  %p4731_p6 = scmp.lt.u32.totalorder %s4727_s20, %s5573_s16 }
0x1978   :  { %p4733_p7 = pnand %p4731_p6, %p4728_p5 }
0x197a   :  { %4736 = shalt.err (!%p4733_p7)
}
0x197b   :  { %s4797_s24 = smov 128   ;;  %s4798_s21 = smov [#allocation6]  }
0x197c   :  { %3902 = dma.vmem_to_hbm [thread:$0]  %s3897_s28, 1024, %s5573_s16, [#allocation5], %s4797_s24, %s4797_s24, %s4793_s27  }
0x197d   :  { %s3908_s29 = sshll.u32 %s4798_s21, 4  ;;  %s3909_s29 = int_to_ptr.vmem [resolvable:$true] %s3908_s29 }
0x197e   :  { %s4737_s7 = scalar_lea.vmem %s3909_s29, 1024  ;;  %p4742_p9 = scmp.lt.s32.totalorder %s3909_s29, %s3909_s29 }
0x197f   :  { %p4738_p8 = scmp.ne.s32.totalorder %s3909_s29, %s4737_s7  ;;  %p4743_p10 = scmp.lt.s32.totalorder %s4737_s7, %s4737_s7 }
0x1981   :  { %p4744_p11 = por %p4743_p10, %p4742_p9 }
0x1983   :  { %p4745_p12 = pnand %p4744_p11, %p4738_p8 }
0x1985   :  { %4748 = shalt.err (!%p4745_p12)
}
0x1986   :  { %s4749_s8 = scalar_lea.hbm %s5574_s17, 1024 }
0x1987   :  { %p4750_p13 = scmp.ne.s32.totalorder %s5574_s17, %s4749_s8  ;;  %p4753_p0 = scmp.lt.u32.totalorder %s4749_s8, %s5574_s17 }
0x1989   :  { %p4755_p1 = pnand %p4753_p0, %p4750_p13 }
0x198b   :  { %4758 = shalt.err (!%p4755_p1)
}
0x198c   :  { %3914 = dma.vmem_to_hbm [thread:$0]  %s3909_s29, 1024, %s5574_s17, [#allocation5], %s4797_s24, %s4797_s24, %s4793_s27  }
0x198d   :  { %v4040_v6 = vld [vmem:[%s5570_s13 + $0x1] ss:$0 sm:$0xff]  ;;  %s4799_s17 = smov [#allocation2]  }
0x198e   :  { %v4041_v33 = vld [vmem:[%s5571_s14 + $0x1] ss:$0 sm:$0xff]  ;;  %s3884_s19 = sshll.u32 %s4799_s17, 4  ;;  %s3885_s19 = int_to_ptr.vmem [resolvable:$true] %s3884_s19 }
0x198f   :  { %s4759_s13 = scalar_lea.vmem %s3885_s19, 256  ;;  %p4764_p3 = scmp.lt.s32.totalorder %s3885_s19, %s3885_s19 }
0x1990   :  { %p4760_p2 = scmp.ne.s32.totalorder %s3885_s19, %s4759_s13  ;;  %p4765_p4 = scmp.lt.s32.totalorder %s4759_s13, %s4759_s13 }
0x1992   :  { %p4766_p5 = por %p4765_p4, %p4764_p3 }
0x1994   :  { %p4767_p6 = pnand %p4766_p5, %p4760_p2 }
0x19ff   :  { %v3850_v23 = vpop.xlane.xlu0 %3849 }
0x1a00   :  { %v3852_v24 = vmul.f32 0.03125, %v3850_v23  ;;  %v3847_v19 = vpop.xlane.xlu1 %3846 }
0x1a01   :  { %v3851_v25 = vmul.f32 0.03125, %v3847_v19 }
0x1a02   :  { %v3854_v7 = vadd.f32 1e-05, %v3852_v24 }
0x1a03   :  { %v3853_v10 = vadd.f32 1e-05, %v3851_v25 }
0x1a04   :  { %4711 = vrsqrt.f32 %v3854_v7 }
0x1a05   :  { %4713 = vrsqrt.f32 %v3853_v10 }
0x1a0e   :  { %v4712_v28 = vpop.eup %4711 }
0x1a0f   :  { %v4714_v29 = vpop.eup %4713  ;;  %v3858_v31 = vmul.f32 %v4712_v28, %v3842_v17 }
0x1a10   :  { %v3857_v32 = vmul.f32 %v4714_v29, %v3841_v18 }
0x1a11   :  { %v3866_v34 = vmul.f32 %v4040_v6, %v3858_v31 }
0x1a12   :  { %v3865_v35 = vmul.f32 %v4040_v6, %v3857_v32 }
0x1a13   :  { %v3874_v36 = vadd.f32 %v4041_v33, %v3866_v34 }
0x1a14   :  { %v3873_v37 = vadd.f32 %v4041_v33, %v3865_v35 }
0x1a15   :  { %v3876_v38 = vadd.f32 %v3874_v36, %v5444_v22 }
0x1a16   :  { %v3875_v40 = vadd.f32 %v3873_v37, %v5440_v26 }
0x1a17   :  { %3878 = vst.msk [vmem:[#allocation2 + $0x8] sm:$0xff] %vm77_vm0, %v3876_v38 }
0x1a18   :  { %3877 = vst.msk [vmem:[#allocation2] sm:$0xff] %vm77_vm0, %v3875_v40 }
0x1a19   :  { %4770 = shalt.err (!%p4767_p6)
}
0x1a1a   :  { %s4771_s20 = scalar_lea.hbm %s5572_s15, 256 }
0x1a1b   :  { %p4772_p7 = scmp.ne.s32.totalorder %s5572_s15, %s4771_s20  ;;  %p4775_p8 = scmp.lt.u32.totalorder %s4771_s20, %s5572_s15 }
0x1a1d   :  { %p4777_p9 = pnand %p4775_p8, %p4772_p7 }
0x1a1f   :  { %4780 = shalt.err (!%p4777_p9)
}
0x1a20   :  { %3890 = dma.vmem_to_hbm [thread:$0]  %s3885_s19, 256, %s5572_s15, [#allocation3], %s4797_s24, %s4797_s24, %s4793_s27  }
0x1a21   :  { %4781 = dma.done.wait [#allocation3], 256  }
0x1a22   :  { %4782 = vsyncadd [#allocation3], 4294967040 }
0x1a23   :  { %4783 = dma.done.wait [#allocation5], 2048  }
0x1a24   :  { %4784 = vsyncadd [#allocation5], 4294965248 }
0x1a25   :  { %3924 = vsyncpa [#allocation3], 1 }
0x1a26   :  { %3925 = vsyncpa [#allocation5], 1 }

</bundles_post_ra>
